<compile_context>
chip_gen: v7x
topology: tpu7x:2x2x1
jax: 0.10.0
libtpu: 0.0.40
codegen_flags: <defaults>
</compile_context>

<pallas_src>
import functools
import math

import jax
import jax.numpy as jnp
from jax.experimental import pallas as pl
from jax.experimental.pallas import tpu as pltpu

LN_EPS = 1e-5
NEG_INF = -1e9

# ---- small GPT-2 config (scaled down from n_embd=768, n_layer=12, n_head=12) ----
VOCAB = 128
D_MODEL = 64
N_HEAD = 4
N_LAYER = 2
MAX_POS = 32
VOCAB_TILE = 128  # lane-dense logits tile; raise to 512-2048 at real vocab (pad V)


# --------------------------- in-kernel helpers ---------------------------

def _layer_norm(x, gamma, beta):
    # f32 statistics
    mean = jnp.mean(x, axis=-1, keepdims=True)
    var = jnp.mean(jnp.square(x - mean), axis=-1, keepdims=True)
    return (x - mean) * jax.lax.rsqrt(var + LN_EPS) * gamma + beta


def _gelu_new(x):
    # GPT-2 "gelu_new" (tanh approximation), f32 on the EUP
    return 0.5 * x * (1.0 + jnp.tanh(jnp.sqrt(2.0 / jnp.pi) * (x + 0.044715 * x * x * x)))


# --------------------------- Pallas kernels ---------------------------

def gpt2_stack_kernel(n_head,
                      x_ref, qb_ref, kb_ref, qp_ref, kp_ref, lnf_g, lnf_b,
                      ln1_g, ln1_b, w_qkv, b_qkv, w_ap, b_ap,
                      ln2_g, ln2_b, w_fc, b_fc, w_mp, b_mp,
                      out_ref, h_ref):
    """One grid step == one transformer block.
    h_ref   : VMEM scratch, f32 residual stream carried across layers.
    out_ref : bf16 ln_f(hidden), written once on the last layer (epilogue)."""
    layer = pl.program_id(0)
    n_layer = pl.num_programs(0)
    H = n_head
    N, D = h_ref.shape
    hd = D // H

    # Initialize the resident residual stream from the embeddings on the first layer only.
    @pl.when(layer == 0)
    def _():
        h_ref[...] = x_ref[...]

    x = h_ref[...]                                               # [N, D] f32

    # Additive attention bias rebuilt in-kernel from O(N) index vectors:
    # causal within a sequence, block-diagonal across the batch, padded keys have kb == -1.
    valid = (qb_ref[...] == kb_ref[...]) & (qp_ref[...] >= kp_ref[...])   # [N, N] bool
    bias = jnp.where(valid, 0.0, NEG_INF)                                 # [N, N] f32

    # ---- attention sub-block: x + W_proj(concat_h softmax(q_h k_h^T/sqrt(hd) + bias) v_h) ----
    h1 = _layer_norm(x, ln1_g[...], ln1_b[...]).astype(jnp.bfloat16)      # [N, D] bf16
    qkv = jnp.dot(h1, w_qkv[...],
                  preferred_element_type=jnp.float32) + b_qkv[...]        # [N, 3D] f32
    scale = 1.0 / math.sqrt(hd)

    ctx_parts = []
    for h in range(H):                                                    # static unroll
        qh = qkv[:, h * hd:(h + 1) * hd].astype(jnp.bfloat16)             # [N, hd]
        kh = qkv[:, D + h * hd:D + (h + 1) * hd].astype(jnp.bfloat16)
        vh = qkv[:, 2 * D + h * hd:2 * D + (h + 1) * hd].astype(jnp.bfloat16)
        s = jax.lax.dot_general(qh, kh, (((1,), (1,)), ((), ())),
                                preferred_element_type=jnp.float32)       # [N, N] == q @ k^T
        s = s * scale + bias
        s = s - jnp.max(s, axis=-1, keepdims=True)                        # f32 stats
        p = jnp.exp(s)
        p = p * pl.reciprocal(jnp.sum(p, axis=-1, keepdims=True), approx=True)
        ctx_parts.append(jnp.dot(p.astype(jnp.bfloat16), vh,
                                 preferred_element_type=jnp.float32))     # [N, hd]
    ctx = jnp.concatenate(ctx_parts, axis=-1).astype(jnp.bfloat16)        # [N, D] (head concat)
    attn = jnp.dot(ctx, w_ap[...],
                   preferred_element_type=jnp.float32) + b_ap[...]        # [N, D]
    x = x + attn

    # ---- MLP sub-block: x + W2 gelu(W1 ln2(x)) ----
    h2 = _layer_norm(x, ln2_g[...], ln2_b[...]).astype(jnp.bfloat16)
    hfc = jnp.dot(h2, w_fc[...], preferred_element_type=jnp.float32) + b_fc[...]
    hfc = _gelu_new(hfc).astype(jnp.bfloat16)
    mlp = jnp.dot(hfc, w_mp[...], preferred_element_type=jnp.float32) + b_mp[...]
    x = x + mlp
    h_ref[...] = x

    # ln_f epilogue on the last layer: LM head never recomputes it per vocab tile.
    @pl.when(layer == n_layer - 1)
    def _():
        out_ref[...] = _layer_norm(x, lnf_g[...], lnf_b[...]).astype(out_ref.dtype)


def lm_head_kernel(h_ref, wte_t_ref, out_ref):
    # Pure vocab-tiled matmul: h is already ln_f'd + bf16-cast by the stack kernel.
    out_ref[...] = jnp.dot(h_ref[...], wte_t_ref[...],
                           preferred_element_type=jnp.float32)


# --------------------------- wrappers (pallas_call glue) ---------------------------

def run_transformer_stack(x, qb, kb, qp, kp, lnf_g, lnf_b, stacked, n_head, n_layer):
    N, D = x.shape

    def const_spec(shape):
        nd = len(shape)
        return pl.BlockSpec(shape, lambda l, _nd=nd: (0,) * _nd)

    def per_layer(shape):
        nd = len(shape)
        return pl.BlockSpec((None,) + shape, lambda l, _nd=nd: (l,) + (0,) * _nd)

    in_specs = [
        const_spec((N, D)),              # x (embeddings), fetched once
        const_spec((N, 1)),              # qb: query batch id
        const_spec((1, N)),              # kb: key batch id (-1 == padded key)
        const_spec((N, 1)),              # qp: query position
        const_spec((1, N)),              # kp: key position
        const_spec((1, D)),              # lnf_g (final LN, epilogue)
        const_spec((1, D)),              # lnf_b
        per_layer((1, D)),               # ln1_g
        per_layer((1, D)),               # ln1_b
        per_layer((D, 3 * D)),           # w_qkv, bf16 (flat, lane-dense 3D output)
        per_layer((1, 3 * D)),           # b_qkv
        per_layer((D, D)),               # w_ap, bf16
        per_layer((1, D)),               # b_ap
        per_layer((1, D)),               # ln2_g
        per_layer((1, D)),               # ln2_b
        per_layer((D, 4 * D)),           # w_fc, bf16
        per_layer((1, 4 * D)),           # b_fc
        per_layer((4 * D, D)),           # w_mp, bf16
        per_layer((1, D)),               # b_mp
    ]
    kernel = functools.partial(gpt2_stack_kernel, n_head)
    return pl.pallas_call(
        kernel,
        out_shape=jax.ShapeDtypeStruct((N, D), jnp.bfloat16),
        grid_spec=pltpu.PrefetchScalarGridSpec(
            num_scalar_prefetch=0,
            grid=(n_layer,),
            in_specs=in_specs,
            out_specs=pl.BlockSpec((N, D), lambda l: (0, 0)),
            scratch_shapes=[pltpu.VMEM((N, D), jnp.float32)],   # carried residual stream
        ),
        compiler_params=pltpu.CompilerParams(
            dimension_semantics=("arbitrary",)),
    )(x, qb, kb, qp, kp, lnf_g, lnf_b,
      stacked['ln1_g'], stacked['ln1_b'], stacked['w_qkv'], stacked['b_qkv'],
      stacked['w_ap'], stacked['b_ap'],
      stacked['ln2_g'], stacked['ln2_b'], stacked['w_fc'], stacked['b_fc'],
      stacked['w_mp'], stacked['b_mp'])


def run_lm_head(h, wte_t, tile_v=VOCAB_TILE):
    N, D = h.shape
    V = wte_t.shape[1]
    return pl.pallas_call(
        lm_head_kernel,
        out_shape=jax.ShapeDtypeStruct((N, V), jnp.float32),
        grid_spec=pltpu.PrefetchScalarGridSpec(
            num_scalar_prefetch=0,
            grid=(pl.cdiv(V, tile_v),),
            in_specs=[
                pl.BlockSpec((N, D), lambda j: (0, 0)),
                pl.BlockSpec((D, tile_v), lambda j: (0, j)),
            ],
            out_specs=pl.BlockSpec((N, tile_v), lambda j: (0, j)),
        ),
        compiler_params=pltpu.CompilerParams(
            dimension_semantics=("parallel",)),
    )(h, wte_t)


def chatbot_forward(packed, input_ids, attention_mask=None):
    """logits = GPT2LMHeadModel(input_ids, attention_mask).logits"""
    B, T = input_ids.shape
    N = B * T

    # Embedding gathers kept in plain JAX (index glue, not the hot path).
    x = packed['wte'][input_ids] + packed['wpe'][:T][None, :, :]
    x = x.reshape(N, D_MODEL).astype(jnp.float32)

    if attention_mask is None:
        attention_mask = jnp.ones((B, T), dtype=jnp.float32)

    # O(N) mask metadata (the dense [N,N] mask is built in-kernel from these).
    tok_b = jnp.repeat(jnp.arange(B, dtype=jnp.int32), T)       # [N] batch id per token
    tok_p = jnp.tile(jnp.arange(T, dtype=jnp.int32), B)         # [N] position per token
    key_ok = attention_mask.reshape(N) > 0.5
    kb = jnp.where(key_ok, tok_b, jnp.int32(-1))                # padded keys never match
    qb = tok_b.reshape(N, 1)
    kb = kb.reshape(1, N)
    qp = tok_p.reshape(N, 1)
    kp = tok_p.reshape(1, N)

    h = run_transformer_stack(x, qb, kb, qp, kp,
                              packed['lnf_g'], packed['lnf_b'],
                              packed['stacked'], N_HEAD, N_LAYER)
    logits = run_lm_head(h, packed['wte_t'])
    return logits.reshape(B, T, VOCAB)


# --------------------------- parameters ---------------------------

def init_params(key, vocab, d, n_layer, max_pos):
    """Standard GPT-2 (HF) layout: Conv1D weights [in, out], biases [out]."""
    ks = iter(jax.random.split(key, 2 + 6 * n_layer))
    std = 0.02
    params = {
        'wte': std * jax.random.normal(next(ks), (vocab, d), jnp.float32),
        'wpe': std * jax.random.normal(next(ks), (max_pos, d), jnp.float32),
        'lnf_g': jnp.ones((d,), jnp.float32),
        'lnf_b': jnp.zeros((d,), jnp.float32),
        'blocks': [],
    }
    for _ in range(n_layer):
        params['blocks'].append({
            'ln1_g': jnp.ones((d,), jnp.float32),
            'ln1_b': jnp.zeros((d,), jnp.float32),
            'w_qkv': std * jax.random.normal(next(ks), (d, 3 * d), jnp.float32),
            'b_qkv': jnp.zeros((3 * d,), jnp.float32),
            'w_ap': std * jax.random.normal(next(ks), (d, d), jnp.float32),
            'b_ap': jnp.zeros((d,), jnp.float32),
            'ln2_g': jnp.ones((d,), jnp.float32),
            'ln2_b': jnp.zeros((d,), jnp.float32),
            'w_fc': std * jax.random.normal(next(ks), (d, 4 * d), jnp.float32),
            'b_fc': jnp.zeros((4 * d,), jnp.float32),
            'w_mp': std * jax.random.normal(next(ks), (4 * d, d), jnp.float32),
            'b_mp': jnp.zeros((d,), jnp.float32),
        })
    return params


def pack_params(params, n_head):
    """One-time layout plumbing: stack layers [L,...], keep flat lane-dense matmul weights
    in bf16 for the MXU, pre-transpose the tied LM head. Done once outside the forward."""
    d = params['wte'].shape[1]
    L = len(params['blocks'])

    def stack(name):
        return jnp.stack([blk[name] for blk in params['blocks']])

    stacked = {
        'ln1_g': stack('ln1_g').reshape(L, 1, d),
        'ln1_b': stack('ln1_b').reshape(L, 1, d),
        'w_qkv': stack('w_qkv').astype(jnp.bfloat16),            # [L, D, 3D]
        'b_qkv': stack('b_qkv').reshape(L, 1, 3 * d),
        'w_ap': stack('w_ap').astype(jnp.bfloat16),              # [L, D, D]
        'b_ap': stack('b_ap').reshape(L, 1, d),
        'ln2_g': stack('ln2_g').reshape(L, 1, d),
        'ln2_b': stack('ln2_b').reshape(L, 1, d),
        'w_fc': stack('w_fc').astype(jnp.bfloat16),              # [L, D, 4D]
        'b_fc': stack('b_fc').reshape(L, 1, 4 * d),
        'w_mp': stack('w_mp').astype(jnp.bfloat16),              # [L, 4D, D]
        'b_mp': stack('b_mp').reshape(L, 1, d),
    }
    return {
        'wte': params['wte'],
        'wpe': params['wpe'],
        'wte_t': params['wte'].T.astype(jnp.bfloat16),           # tied LM head, transposed once
        'lnf_g': params['lnf_g'].reshape(1, d),
        'lnf_b': params['lnf_b'].reshape(1, d),
        'stacked': stacked,
    }


# --------------------------- main ---------------------------

if __name__ == "__main__":
    key = jax.random.PRNGKey(0)
    pkey, ikey = jax.random.split(key)

    B, T = 2, 8
    params = init_params(pkey, VOCAB, D_MODEL, N_LAYER, MAX_POS)
    packed = pack_params(params, N_HEAD)

    input_ids = jax.random.randint(ikey, (B, T), 0, VOCAB, dtype=jnp.int32)
    # second sequence has its last two positions padded out
    attention_mask = (jnp.arange(T)[None, :] < jnp.array([[T], [T - 2]])).astype(jnp.float32)

    fwd = jax.jit(functools.partial(chatbot_forward, packed))
    logits = fwd(input_ids, attention_mask)
    jax.block_until_ready(logits)

    assert logits.shape == (B, T, VOCAB), logits.shape
    assert bool(jnp.all(jnp.isfinite(logits))), "non-finite logits"
    print("KERNEL_OK")
</pallas_src>

<mosaic_0001>
module attributes {stable_mosaic.version = 11 : i64} {
  func.func @lm_head_kernel(%arg0: i32, %arg1: memref<16x64xbf16, #tpu.memory_space<vmem>>, %arg2: memref<64x128xbf16, #tpu.memory_space<vmem>>, %arg3: memref<16x128xf32, #tpu.memory_space<vmem>>) attributes {dimension_semantics = [#tpu.dimension_semantics<parallel>], iteration_bounds = array<i64: 1>, scalar_prefetch = 0 : i64, scratch_operands = 0 : i64, tpu.core_type = #tpu.core_type<tc>, window_params = [{pipeline_mode = #tpu.pipeline_mode<synchronous>, transform_indices = @transform_0, window_bounds = array<i64: 16, 64>}, {transform_indices = @transform_1, window_bounds = array<i64: 64, 128>}, {transform_indices = @transform_2, window_bounds = array<i64: 16, 128>}]} {
    %c0 = arith.constant 0 : index
    %c0_0 = arith.constant 0 : index
    %0 = vector.load %arg1[%c0, %c0_0] : memref<16x64xbf16, #tpu.memory_space<vmem>>, vector<16x64xbf16>
    %c0_1 = arith.constant 0 : index
    %c0_2 = arith.constant 0 : index
    %1 = vector.load %arg2[%c0_1, %c0_2] : memref<64x128xbf16, #tpu.memory_space<vmem>>, vector<64x128xbf16>
    %cst = arith.constant dense<0.000000e+00> : vector<16x128xf32>
    %2 = tpu.matmul %0, %1, %cst {dimension_numbers = #tpu.dot_dimension_numbers<[1], [0], [0], [1], [0, 0, 1, 1], [], []>} : vector<16x64xbf16>, vector<64x128xbf16>, vector<16x128xf32> -> vector<16x128xf32>
    %c0_3 = arith.constant 0 : index
    %c0_4 = arith.constant 0 : index
    %3 = vector.load %arg3[%c0_3, %c0_4] : memref<16x128xf32, #tpu.memory_space<vmem>>, vector<16x128xf32>
    tpu.vector_store %arg3[%c0_3, %c0_4], %2 {strides = array<i32>} : memref<16x128xf32, #tpu.memory_space<vmem>>, vector<16x128xf32>,
    return
  }
  func.func @transform_0(%arg0: i32) -> (i32, i32) {
    %c0_i32 = arith.constant 0 : i32
    %c0_i32_0 = arith.constant 0 : i32
    %c0_i32_1 = arith.constant 0 : i32
    return %c0_i32, %c0_i32_0 : i32, i32
  }
  func.func @transform_1(%arg0: i32) -> (i32, i32) {
    %c0_i32 = arith.constant 0 : i32
    %c0_i32_0 = arith.constant 0 : i32
    return %c0_i32, %arg0 : i32, i32
  }
  func.func @transform_2(%arg0: i32) -> (i32, i32) {
    %c0_i32 = arith.constant 0 : i32
    %c0_i32_0 = arith.constant 0 : i32
    return %c0_i32, %arg0 : i32, i32
  }
}

module attributes {stable_mosaic.version = 11 : i64} {
  func.func @gpt2_stack_kernel(%arg0: i32, %arg1: memref<16x64xf32, #tpu.memory_space<vmem>>, %arg2: memref<16x1xi32, #tpu.memory_space<vmem>>, %arg3: memref<1x16xi32, #tpu.memory_space<vmem>>, %arg4: memref<16x1xi32, #tpu.memory_space<vmem>>, %arg5: memref<1x16xi32, #tpu.memory_space<vmem>>, %arg6: memref<1x64xf32, #tpu.memory_space<vmem>>, %arg7: memref<1x64xf32, #tpu.memory_space<vmem>>, %arg8: memref<1x1x64xf32, #tpu.memory_space<vmem>>, %arg9: memref<1x1x64xf32, #tpu.memory_space<vmem>>, %arg10: memref<1x64x192xbf16, #tpu.memory_space<vmem>>, %arg11: memref<1x1x192xf32, #tpu.memory_space<vmem>>, %arg12: memref<1x64x64xbf16, #tpu.memory_space<vmem>>, %arg13: memref<1x1x64xf32, #tpu.memory_space<vmem>>, %arg14: memref<1x1x64xf32, #tpu.memory_space<vmem>>, %arg15: memref<1x1x64xf32, #tpu.memory_space<vmem>>, %arg16: memref<1x64x256xbf16, #tpu.memory_space<vmem>>, %arg17: memref<1x1x256xf32, #tpu.memory_space<vmem>>, %arg18: memref<1x256x64xbf16, #tpu.memory_space<vmem>>, %arg19: memref<1x1x64xf32, #tpu.memory_space<vmem>>, %arg20: memref<16x64xbf16, #tpu.memory_space<vmem>>, %arg21: memref<16x64xf32, #tpu.memory_space<vmem>>) attributes {dimension_semantics = [#tpu.dimension_semantics<arbitrary>], iteration_bounds = array<i64: 2>, scalar_prefetch = 0 : i64, scratch_operands = 1 : i64, tpu.core_type = #tpu.core_type<tc>, window_params = [{pipeline_mode = #tpu.pipeline_mode<synchronous>, transform_indices = @transform_0, window_bounds = array<i64: 16, 64>}, {pipeline_mode = #tpu.pipeline_mode<synchronous>, transform_indices = @transform_1, window_bounds = array<i64: 16, 1>}, {pipeline_mode = #tpu.pipeline_mode<synchronous>, transform_indices = @transform_2, window_bounds = array<i64: 1, 16>}, {pipeline_mode = #tpu.pipeline_mode<synchronous>, transform_indices = @transform_3, window_bounds = array<i64: 16, 1>}, {pipeline_mode = #tpu.pipeline_mode<synchronous>, transform_indices = @transform_4, window_bounds = array<i64: 1, 16>}, {pipeline_mode = #tpu.pipeline_mode<synchronous>, transform_indices = @transform_5, window_bounds = array<i64: 1, 64>}, {pipeline_mode = #tpu.pipeline_mode<synchronous>, transform_indices = @transform_6, window_bounds = array<i64: 1, 64>}, {transform_indices = @transform_7, window_bounds = array<i64: 1, 1, 64>}, {transform_indices = @transform_8, window_bounds = array<i64: 1, 1, 64>}, {transform_indices = @transform_9, window_bounds = array<i64: 1, 64, 192>}, {transform_indices = @transform_10, window_bounds = array<i64: 1, 1, 192>}, {transform_indices = @transform_11, window_bounds = array<i64: 1, 64, 64>}, {transform_indices = @transform_12, window_bounds = array<i64: 1, 1, 64>}, {transform_indices = @transform_13, window_bounds = array<i64: 1, 1, 64>}, {transform_indices = @transform_14, window_bounds = array<i64: 1, 1, 64>}, {transform_indices = @transform_15, window_bounds = array<i64: 1, 64, 256>}, {transform_indices = @transform_16, window_bounds = array<i64: 1, 1, 256>}, {transform_indices = @transform_17, window_bounds = array<i64: 1, 256, 64>}, {transform_indices = @transform_18, window_bounds = array<i64: 1, 1, 64>}, {pipeline_mode = #tpu.pipeline_mode<synchronous>, transform_indices = @transform_19, window_bounds = array<i64: 16, 64>}]} {
    %c0_i32 = arith.constant 0 : i32
    %0 = arith.cmpi eq, %arg0, %c0_i32 : i32
    %1 = arith.extui %0 : i1 to i32
    %c0_i32_0 = arith.constant 0 : i32
    %2 = arith.cmpi ne, %1, %c0_i32_0 : i32
    scf.if %2 {
      %c0_88 = arith.constant 0 : index
      %c0_89 = arith.constant 0 : index
      %211 = vector.load %arg1[%c0_88, %c0_89] : memref<16x64xf32, #tpu.memory_space<vmem>>, vector<16x64xf32>
      %c0_90 = arith.constant 0 : index
      %c0_91 = arith.constant 0 : index
      %212 = vector.load %arg21[%c0_90, %c0_91] : memref<16x64xf32, #tpu.memory_space<vmem>>, vector<16x64xf32>
      tpu.vector_store %arg21[%c0_90, %c0_91], %211 {strides = array<i32>} : memref<16x64xf32, #tpu.memory_space<vmem>>, vector<16x64xf32>,
    } else {
    }
    %c0 = arith.constant 0 : index
    %c0_1 = arith.constant 0 : index
    %3 = vector.load %arg21[%c0, %c0_1] : memref<16x64xf32, #tpu.memory_space<vmem>>, vector<16x64xf32>
    %c0_2 = arith.constant 0 : index
    %c0_3 = arith.constant 0 : index
    %4 = vector.load %arg2[%c0_2, %c0_3] : memref<16x1xi32, #tpu.memory_space<vmem>>, vector<16x1xi32>
    %c0_4 = arith.constant 0 : index
    %c0_5 = arith.constant 0 : index
    %5 = vector.load %arg3[%c0_4, %c0_5] : memref<1x16xi32, #tpu.memory_space<vmem>>, vector<1x16xi32>
    %6 = vector.broadcast %4 : vector<16x1xi32> to vector<16x16xi32>
    %7 = vector.broadcast %5 : vector<1x16xi32> to vector<16x16xi32>
    %8 = arith.cmpi eq, %6, %7 : vector<16x16xi32>
    %c0_6 = arith.constant 0 : index
    %c0_7 = arith.constant 0 : index
    %9 = vector.load %arg4[%c0_6, %c0_7] : memref<16x1xi32, #tpu.memory_space<vmem>>, vector<16x1xi32>
    %c0_8 = arith.constant 0 : index
    %c0_9 = arith.constant 0 : index
    %10 = vector.load %arg5[%c0_8, %c0_9] : memref<1x16xi32, #tpu.memory_space<vmem>>, vector<1x16xi32>
    %11 = vector.broadcast %9 : vector<16x1xi32> to vector<16x16xi32>
    %12 = vector.broadcast %10 : vector<1x16xi32> to vector<16x16xi32>
    %13 = arith.cmpi sge, %11, %12 : vector<16x16xi32>
    %14 = arith.andi %8, %13 : vector<16x16xi1>
    %cst = arith.constant 0.000000e+00 : f32
    %cst_10 = arith.constant -1.000000e+09 : f32
    %15 = vector.broadcast %cst : f32 to vector<16x16xf32>
    %16 = vector.broadcast %cst_10 : f32 to vector<16x16xf32>
    %17 = arith.select %14, %15, %16 : vector<16x16xi1>, vector<16x16xf32>
    %c0_11 = arith.constant 0 : index
    %c0_12 = arith.constant 0 : index
    %c0_13 = arith.constant 0 : index
    %18 = vector.load %arg8[%c0_11, %c0_12, %c0_13] : memref<1x1x64xf32, #tpu.memory_space<vmem>>, vector<1x1x64xf32>
    %19 = vector.shape_cast %18 : vector<1x1x64xf32> to vector<1x64xf32>
    %c0_14 = arith.constant 0 : index
    %c0_15 = arith.constant 0 : index
    %c0_16 = arith.constant 0 : index
    %20 = vector.load %arg9[%c0_14, %c0_15, %c0_16] : memref<1x1x64xf32, #tpu.memory_space<vmem>>, vector<1x1x64xf32>
    %21 = vector.shape_cast %20 : vector<1x1x64xf32> to vector<1x64xf32>
    %cst_17 = arith.constant dense<0.000000e+00> : vector<16xf32>
    %22 = vector.multi_reduction <add>, %3, %cst_17 [1] : vector<16x64xf32> to vector<16xf32>
    %23 = vector.shape_cast %22 : vector<16xf32> to vector<16x1xf32>
    %cst_18 = arith.constant 6.400000e+01 : f32
    %24 = vector.broadcast %cst_18 : f32 to vector<16x1xf32>
    %25 = arith.divf %23, %24 : vector<16x1xf32>
    %26 = vector.broadcast %25 : vector<16x1xf32> to vector<16x64xf32>
    %27 = arith.subf %3, %26 : vector<16x64xf32>
    %28 = arith.mulf %27, %27 : vector<16x64xf32>
    %cst_19 = arith.constant dense<0.000000e+00> : vector<16xf32>
    %29 = vector.multi_reduction <add>, %28, %cst_19 [1] : vector<16x64xf32> to vector<16xf32>
    %30 = vector.shape_cast %29 : vector<16xf32> to vector<16x1xf32>
    %cst_20 = arith.constant 6.400000e+01 : f32
    %31 = vector.broadcast %cst_20 : f32 to vector<16x1xf32>
    %32 = arith.divf %30, %31 : vector<16x1xf32>
    %33 = vector.broadcast %25 : vector<16x1xf32> to vector<16x64xf32>
    %34 = arith.subf %3, %33 : vector<16x64xf32>
    %cst_21 = arith.constant 9.99999974E-6 : f32
    %35 = vector.broadcast %cst_21 : f32 to vector<16x1xf32>
    %36 = arith.addf %32, %35 : vector<16x1xf32>
    %37 = math.rsqrt %36 : vector<16x1xf32>
    %38 = vector.broadcast %37 : vector<16x1xf32> to vector<16x64xf32>
    %39 = arith.mulf %34, %38 : vector<16x64xf32>
    %40 = vector.broadcast %19 : vector<1x64xf32> to vector<16x64xf32>
    %41 = arith.mulf %39, %40 : vector<16x64xf32>
    %42 = vector.broadcast %21 : vector<1x64xf32> to vector<16x64xf32>
    %43 = arith.addf %41, %42 : vector<16x64xf32>
    %44 = arith.truncf %43 : vector<16x64xf32> to vector<16x64xbf16>
    %c0_22 = arith.constant 0 : index
    %c0_23 = arith.constant 0 : index
    %c0_24 = arith.constant 0 : index
    %45 = vector.load %arg10[%c0_22, %c0_23, %c0_24] : memref<1x64x192xbf16, #tpu.memory_space<vmem>>, vector<1x64x192xbf16>
    %46 = vector.shape_cast %45 : vector<1x64x192xbf16> to vector<64x192xbf16>
    %cst_25 = arith.constant dense<0.000000e+00> : vector<16x192xf32>
    %47 = tpu.matmul %44, %46, %cst_25 {dimension_numbers = #tpu.dot_dimension_numbers<[1], [0], [0], [1], [0, 0, 1, 1], [], []>} : vector<16x64xbf16>, vector<64x192xbf16>, vector<16x192xf32> -> vector<16x192xf32>
    %c0_26 = arith.constant 0 : index
    %c0_27 = arith.constant 0 : index
    %c0_28 = arith.constant 0 : index
    %48 = vector.load %arg11[%c0_26, %c0_27, %c0_28] : memref<1x1x192xf32, #tpu.memory_space<vmem>>, vector<1x1x192xf32>
    %49 = vector.shape_cast %48 : vector<1x1x192xf32> to vector<1x192xf32>
    %50 = vector.broadcast %49 : vector<1x192xf32> to vector<16x192xf32>
    %51 = arith.addf %47, %50 : vector<16x192xf32>
    %52 = vector.extract_strided_slice %51 {offsets = [0, 0], sizes = [16, 16], strides = [1, 1]} : vector<16x192xf32> to vector<16x16xf32>
    %53 = arith.truncf %52 : vector<16x16xf32> to vector<16x16xbf16>
    %54 = vector.extract_strided_slice %51 {offsets = [0, 64], sizes = [16, 16], strides = [1, 1]} : vector<16x192xf32> to vector<16x16xf32>
    %55 = arith.truncf %54 : vector<16x16xf32> to vector<16x16xbf16>
    %56 = vector.extract_strided_slice %51 {offsets = [0, 128], sizes = [16, 16], strides = [1, 1]} : vector<16x192xf32> to vector<16x16xf32>
    %57 = arith.truncf %56 : vector<16x16xf32> to vector<16x16xbf16>
    %cst_29 = arith.constant dense<0.000000e+00> : vector<16x16xf32>
    %58 = tpu.matmul %53, %55, %cst_29 {dimension_numbers = #tpu.dot_dimension_numbers<[1], [1], [0], [0], [0, 0, 1, 0], [], []>} : vector<16x16xbf16>, vector<16x16xbf16>, vector<16x16xf32> -> vector<16x16xf32>
    %cst_30 = arith.constant 2.500000e-01 : f32
    %59 = vector.broadcast %cst_30 : f32 to vector<16x16xf32>
    %60 = arith.mulf %58, %59 : vector<16x16xf32>
    %61 = arith.addf %60, %17 : vector<16x16xf32>
    %cst_31 = arith.constant dense<0xFF800000> : vector<16xf32>
    %62 = vector.multi_reduction <maximumf>, %61, %cst_31 [1] : vector<16x16xf32> to vector<16xf32>
    %63 = vector.shape_cast %62 : vector<16xf32> to vector<16x1xf32>
    %64 = vector.broadcast %63 : vector<16x1xf32> to vector<16x16xf32>
    %65 = arith.subf %61, %64 : vector<16x16xf32>
    %66 = math.exp %65 : vector<16x16xf32>
    %cst_32 = arith.constant dense<0.000000e+00> : vector<16xf32>
    %67 = vector.multi_reduction <add>, %66, %cst_32 [1] : vector<16x16xf32> to vector<16xf32>
    %68 = vector.shape_cast %67 : vector<16xf32> to vector<16x1xf32>
    %69 = tpu.reciprocal %68 {approx = true} : vector<16x1xf32> -> vector<16x1xf32>
    %70 = vector.broadcast %69 : vector<16x1xf32> to vector<16x16xf32>
    %71 = arith.mulf %66, %70 : vector<16x16xf32>
    %72 = arith.truncf %71 : vector<16x16xf32> to vector<16x16xbf16>
    %cst_33 = arith.constant dense<0.000000e+00> : vector<16x16xf32>
    %73 = tpu.matmul %72, %57, %cst_33 {dimension_numbers = #tpu.dot_dimension_numbers<[1], [0], [0], [1], [0, 0, 1, 1], [], []>} : vector<16x16xbf16>, vector<16x16xbf16>, vector<16x16xf32> -> vector<16x16xf32>
    %74 = vector.extract_strided_slice %51 {offsets = [0, 16], sizes = [16, 16], strides = [1, 1]} : vector<16x192xf32> to vector<16x16xf32>
    %75 = arith.truncf %74 : vector<16x16xf32> to vector<16x16xbf16>
    %76 = vector.extract_strided_slice %51 {offsets = [0, 80], sizes = [16, 16], strides = [1, 1]} : vector<16x192xf32> to vector<16x16xf32>
    %77 = arith.truncf %76 : vector<16x16xf32> to vector<16x16xbf16>
    %78 = vector.extract_strided_slice %51 {offsets = [0, 144], sizes = [16, 16], strides = [1, 1]} : vector<16x192xf32> to vector<16x16xf32>
    %79 = arith.truncf %78 : vector<16x16xf32> to vector<16x16xbf16>
    %cst_34 = arith.constant dense<0.000000e+00> : vector<16x16xf32>
    %80 = tpu.matmul %75, %77, %cst_34 {dimension_numbers = #tpu.dot_dimension_numbers<[1], [1], [0], [0], [0, 0, 1, 0], [], []>} : vector<16x16xbf16>, vector<16x16xbf16>, vector<16x16xf32> -> vector<16x16xf32>
    %cst_35 = arith.constant 2.500000e-01 : f32
    %81 = vector.broadcast %cst_35 : f32 to vector<16x16xf32>
    %82 = arith.mulf %80, %81 : vector<16x16xf32>
    %83 = arith.addf %82, %17 : vector<16x16xf32>
    %cst_36 = arith.constant dense<0xFF800000> : vector<16xf32>
    %84 = vector.multi_reduction <maximumf>, %83, %cst_36 [1] : vector<16x16xf32> to vector<16xf32>
    %85 = vector.shape_cast %84 : vector<16xf32> to vector<16x1xf32>
    %86 = vector.broadcast %85 : vector<16x1xf32> to vector<16x16xf32>
    %87 = arith.subf %83, %86 : vector<16x16xf32>
    %88 = math.exp %87 : vector<16x16xf32>
    %cst_37 = arith.constant dense<0.000000e+00> : vector<16xf32>
    %89 = vector.multi_reduction <add>, %88, %cst_37 [1] : vector<16x16xf32> to vector<16xf32>
    %90 = vector.shape_cast %89 : vector<16xf32> to vector<16x1xf32>
    %91 = tpu.reciprocal %90 {approx = true} : vector<16x1xf32> -> vector<16x1xf32>
    %92 = vector.broadcast %91 : vector<16x1xf32> to vector<16x16xf32>
    %93 = arith.mulf %88, %92 : vector<16x16xf32>
    %94 = arith.truncf %93 : vector<16x16xf32> to vector<16x16xbf16>
    %cst_38 = arith.constant dense<0.000000e+00> : vector<16x16xf32>
    %95 = tpu.matmul %94, %79, %cst_38 {dimension_numbers = #tpu.dot_dimension_numbers<[1], [0], [0], [1], [0, 0, 1, 1], [], []>} : vector<16x16xbf16>, vector<16x16xbf16>, vector<16x16xf32> -> vector<16x16xf32>
    %96 = vector.extract_strided_slice %51 {offsets = [0, 32], sizes = [16, 16], strides = [1, 1]} : vector<16x192xf32> to vector<16x16xf32>
    %97 = arith.truncf %96 : vector<16x16xf32> to vector<16x16xbf16>
    %98 = vector.extract_strided_slice %51 {offsets = [0, 96], sizes = [16, 16], strides = [1, 1]} : vector<16x192xf32> to vector<16x16xf32>
    %99 = arith.truncf %98 : vector<16x16xf32> to vector<16x16xbf16>
    %100 = vector.extract_strided_slice %51 {offsets = [0, 160], sizes = [16, 16], strides = [1, 1]} : vector<16x192xf32> to vector<16x16xf32>
    %101 = arith.truncf %100 : vector<16x16xf32> to vector<16x16xbf16>
    %cst_39 = arith.constant dense<0.000000e+00> : vector<16x16xf32>
    %102 = tpu.matmul %97, %99, %cst_39 {dimension_numbers = #tpu.dot_dimension_numbers<[1], [1], [0], [0], [0, 0, 1, 0], [], []>} : vector<16x16xbf16>, vector<16x16xbf16>, vector<16x16xf32> -> vector<16x16xf32>
    %cst_40 = arith.constant 2.500000e-01 : f32
    %103 = vector.broadcast %cst_40 : f32 to vector<16x16xf32>
    %104 = arith.mulf %102, %103 : vector<16x16xf32>
    %105 = arith.addf %104, %17 : vector<16x16xf32>
    %cst_41 = arith.constant dense<0xFF800000> : vector<16xf32>
    %106 = vector.multi_reduction <maximumf>, %105, %cst_41 [1] : vector<16x16xf32> to vector<16xf32>
    %107 = vector.shape_cast %106 : vector<16xf32> to vector<16x1xf32>
    %108 = vector.broadcast %107 : vector<16x1xf32> to vector<16x16xf32>
    %109 = arith.subf %105, %108 : vector<16x16xf32>
    %110 = math.exp %109 : vector<16x16xf32>
    %cst_42 = arith.constant dense<0.000000e+00> : vector<16xf32>
    %111 = vector.multi_reduction <add>, %110, %cst_42 [1] : vector<16x16xf32> to vector<16xf32>
    %112 = vector.shape_cast %111 : vector<16xf32> to vector<16x1xf32>
    %113 = tpu.reciprocal %112 {approx = true} : vector<16x1xf32> -> vector<16x1xf32>
    %114 = vector.broadcast %113 : vector<16x1xf32> to vector<16x16xf32>
    %115 = arith.mulf %110, %114 : vector<16x16xf32>
    %116 = arith.truncf %115 : vector<16x16xf32> to vector<16x16xbf16>
    %cst_43 = arith.constant dense<0.000000e+00> : vector<16x16xf32>
    %117 = tpu.matmul %116, %101, %cst_43 {dimension_numbers = #tpu.dot_dimension_numbers<[1], [0], [0], [1], [0, 0, 1, 1], [], []>} : vector<16x16xbf16>, vector<16x16xbf16>, vector<16x16xf32> -> vector<16x16xf32>
    %118 = vector.extract_strided_slice %51 {offsets = [0, 48], sizes = [16, 16], strides = [1, 1]} : vector<16x192xf32> to vector<16x16xf32>
    %119 = arith.truncf %118 : vector<16x16xf32> to vector<16x16xbf16>
    %120 = vector.extract_strided_slice %51 {offsets = [0, 112], sizes = [16, 16], strides = [1, 1]} : vector<16x192xf32> to vector<16x16xf32>
    %121 = arith.truncf %120 : vector<16x16xf32> to vector<16x16xbf16>
    %122 = vector.extract_strided_slice %51 {offsets = [0, 176], sizes = [16, 16], strides = [1, 1]} : vector<16x192xf32> to vector<16x16xf32>
    %123 = arith.truncf %122 : vector<16x16xf32> to vector<16x16xbf16>
    %cst_44 = arith.constant dense<0.000000e+00> : vector<16x16xf32>
    %124 = tpu.matmul %119, %121, %cst_44 {dimension_numbers = #tpu.dot_dimension_numbers<[1], [1], [0], [0], [0, 0, 1, 0], [], []>} : vector<16x16xbf16>, vector<16x16xbf16>, vector<16x16xf32> -> vector<16x16xf32>
    %cst_45 = arith.constant 2.500000e-01 : f32
    %125 = vector.broadcast %cst_45 : f32 to vector<16x16xf32>
    %126 = arith.mulf %124, %125 : vector<16x16xf32>
    %127 = arith.addf %126, %17 : vector<16x16xf32>
    %cst_46 = arith.constant dense<0xFF800000> : vector<16xf32>
    %128 = vector.multi_reduction <maximumf>, %127, %cst_46 [1] : vector<16x16xf32> to vector<16xf32>
    %129 = vector.shape_cast %128 : vector<16xf32> to vector<16x1xf32>
    %130 = vector.broadcast %129 : vector<16x1xf32> to vector<16x16xf32>
    %131 = arith.subf %127, %130 : vector<16x16xf32>
    %132 = math.exp %131 : vector<16x16xf32>
    %cst_47 = arith.constant dense<0.000000e+00> : vector<16xf32>
    %133 = vector.multi_reduction <add>, %132, %cst_47 [1] : vector<16x16xf32> to vector<16xf32>
    %134 = vector.shape_cast %133 : vector<16xf32> to vector<16x1xf32>
    %135 = tpu.reciprocal %134 {approx = true} : vector<16x1xf32> -> vector<16x1xf32>
    %136 = vector.broadcast %135 : vector<16x1xf32> to vector<16x16xf32>
    %137 = arith.mulf %132, %136 : vector<16x16xf32>
    %138 = arith.truncf %137 : vector<16x16xf32> to vector<16x16xbf16>
    %cst_48 = arith.constant dense<0.000000e+00> : vector<16x16xf32>
    %139 = tpu.matmul %138, %123, %cst_48 {dimension_numbers = #tpu.dot_dimension_numbers<[1], [0], [0], [1], [0, 0, 1, 1], [], []>} : vector<16x16xbf16>, vector<16x16xbf16>, vector<16x16xf32> -> vector<16x16xf32>
    %140 = tpu.concatenate %73, %95, %117, %139 in 1 : vector<16x16xf32>, vector<16x16xf32>, vector<16x16xf32>, vector<16x16xf32> -> vector<16x64xf32>
    %141 = arith.truncf %140 : vector<16x64xf32> to vector<16x64xbf16>
    %c0_49 = arith.constant 0 : index
    %c0_50 = arith.constant 0 : index
    %c0_51 = arith.constant 0 : index
    %142 = vector.load %arg12[%c0_49, %c0_50, %c0_51] : memref<1x64x64xbf16, #tpu.memory_space<vmem>>, vector<1x64x64xbf16>
    %143 = vector.shape_cast %142 : vector<1x64x64xbf16> to vector<64x64xbf16>
    %cst_52 = arith.constant dense<0.000000e+00> : vector<16x64xf32>
    %144 = tpu.matmul %141, %143, %cst_52 {dimension_numbers = #tpu.dot_dimension_numbers<[1], [0], [0], [1], [0, 0, 1, 1], [], []>} : vector<16x64xbf16>, vector<64x64xbf16>, vector<16x64xf32> -> vector<16x64xf32>
    %c0_53 = arith.constant 0 : index
    %c0_54 = arith.constant 0 : index
    %c0_55 = arith.constant 0 : index
    %145 = vector.load %arg13[%c0_53, %c0_54, %c0_55] : memref<1x1x64xf32, #tpu.memory_space<vmem>>, vector<1x1x64xf32>
    %146 = vector.shape_cast %145 : vector<1x1x64xf32> to vector<1x64xf32>
    %147 = vector.broadcast %146 : vector<1x64xf32> to vector<16x64xf32>
    %148 = arith.addf %144, %147 : vector<16x64xf32>
    %149 = arith.addf %3, %148 : vector<16x64xf32>
    %c0_56 = arith.constant 0 : index
    %c0_57 = arith.constant 0 : index
    %c0_58 = arith.constant 0 : index
    %150 = vector.load %arg14[%c0_56, %c0_57, %c0_58] : memref<1x1x64xf32, #tpu.memory_space<vmem>>, vector<1x1x64xf32>
    %151 = vector.shape_cast %150 : vector<1x1x64xf32> to vector<1x64xf32>
    %c0_59 = arith.constant 0 : index
    %c0_60 = arith.constant 0 : index
    %c0_61 = arith.constant 0 : index
    %152 = vector.load %arg15[%c0_59, %c0_60, %c0_61] : memref<1x1x64xf32, #tpu.memory_space<vmem>>, vector<1x1x64xf32>
    %153 = vector.shape_cast %152 : vector<1x1x64xf32> to vector<1x64xf32>
    %cst_62 = arith.constant dense<0.000000e+00> : vector<16xf32>
    %154 = vector.multi_reduction <add>, %149, %cst_62 [1] : vector<16x64xf32> to vector<16xf32>
    %155 = vector.shape_cast %154 : vector<16xf32> to vector<16x1xf32>
    %cst_63 = arith.constant 6.400000e+01 : f32
    %156 = vector.broadcast %cst_63 : f32 to vector<16x1xf32>
    %157 = arith.divf %155, %156 : vector<16x1xf32>
    %158 = vector.broadcast %157 : vector<16x1xf32> to vector<16x64xf32>
    %159 = arith.subf %149, %158 : vector<16x64xf32>
    %160 = arith.mulf %159, %159 : vector<16x64xf32>
    %cst_64 = arith.constant dense<0.000000e+00> : vector<16xf32>
    %161 = vector.multi_reduction <add>, %160, %cst_64 [1] : vector<16x64xf32> to vector<16xf32>
    %162 = vector.shape_cast %161 : vector<16xf32> to vector<16x1xf32>
    %cst_65 = arith.constant 6.400000e+01 : f32
    %163 = vector.broadcast %cst_65 : f32 to vector<16x1xf32>
    %164 = arith.divf %162, %163 : vector<16x1xf32>
    %165 = vector.broadcast %157 : vector<16x1xf32> to vector<16x64xf32>
    %166 = arith.subf %149, %165 : vector<16x64xf32>
    %cst_66 = arith.constant 9.99999974E-6 : f32
    %167 = vector.broadcast %cst_66 : f32 to vector<16x1xf32>
    %168 = arith.addf %164, %167 : vector<16x1xf32>
    %169 = math.rsqrt %168 : vector<16x1xf32>
    %170 = vector.broadcast %169 : vector<16x1xf32> to vector<16x64xf32>
    %171 = arith.mulf %166, %170 : vector<16x64xf32>
    %172 = vector.broadcast %151 : vector<1x64xf32> to vector<16x64xf32>
    %173 = arith.mulf %171, %172 : vector<16x64xf32>
    %174 = vector.broadcast %153 : vector<1x64xf32> to vector<16x64xf32>
    %175 = arith.addf %173, %174 : vector<16x64xf32>
    %176 = arith.truncf %175 : vector<16x64xf32> to vector<16x64xbf16>
    %c0_67 = arith.constant 0 : index
    %c0_68 = arith.constant 0 : index
    %c0_69 = arith.constant 0 : index
    %177 = vector.load %arg16[%c0_67, %c0_68, %c0_69] : memref<1x64x256xbf16, #tpu.memory_space<vmem>>, vector<1x64x256xbf16>
    %178 = vector.shape_cast %177 : vector<1x64x256xbf16> to vector<64x256xbf16>
    %cst_70 = arith.constant dense<0.000000e+00> : vector<16x256xf32>
    %179 = tpu.matmul %176, %178, %cst_70 {dimension_numbers = #tpu.dot_dimension_numbers<[1], [0], [0], [1], [0, 0, 1, 1], [], []>} : vector<16x64xbf16>, vector<64x256xbf16>, vector<16x256xf32> -> vector<16x256xf32>
    %c0_71 = arith.constant 0 : index
    %c0_72 = arith.constant 0 : index
    %c0_73 = arith.constant 0 : index
    %180 = vector.load %arg17[%c0_71, %c0_72, %c0_73] : memref<1x1x256xf32, #tpu.memory_space<vmem>>, vector<1x1x256xf32>
    %181 = vector.shape_cast %180 : vector<1x1x256xf32> to vector<1x256xf32>
    %182 = vector.broadcast %181 : vector<1x256xf32> to vector<16x256xf32>
    %183 = arith.addf %179, %182 : vector<16x256xf32>
    %cst_74 = arith.constant 5.000000e-01 : f32
    %184 = vector.broadcast %cst_74 : f32 to vector<16x256xf32>
    %185 = arith.mulf %184, %183 : vector<16x256xf32>
    %cst_75 = arith.constant 0.636619746 : f32
    %186 = math.sqrt %cst_75 : f32
    %cst_76 = arith.constant 4.471500e-02 : f32
    %187 = vector.broadcast %cst_76 : f32 to vector<16x256xf32>
    %188 = arith.mulf %187, %183 : vector<16x256xf32>
    %189 = arith.mulf %188, %183 : vector<16x256xf32>
    %190 = arith.mulf %189, %183 : vector<16x256xf32>
    %191 = arith.addf %183, %190 : vector<16x256xf32>
    %192 = vector.broadcast %186 : f32 to vector<16x256xf32>
    %193 = arith.mulf %192, %191 : vector<16x256xf32>
    %194 = math.tanh %193 : vector<16x256xf32>
    %cst_77 = arith.constant 1.000000e+00 : f32
    %195 = vector.broadcast %cst_77 : f32 to vector<16x256xf32>
    %196 = arith.addf %195, %194 : vector<16x256xf32>
    %197 = arith.mulf %185, %196 : vector<16x256xf32>
    %198 = arith.truncf %197 : vector<16x256xf32> to vector<16x256xbf16>
    %c0_78 = arith.constant 0 : index
    %c0_79 = arith.constant 0 : index
    %c0_80 = arith.constant 0 : index
    %199 = vector.load %arg18[%c0_78, %c0_79, %c0_80] : memref<1x256x64xbf16, #tpu.memory_space<vmem>>, vector<1x256x64xbf16>
    %200 = vector.shape_cast %199 : vector<1x256x64xbf16> to vector<256x64xbf16>
    %cst_81 = arith.constant dense<0.000000e+00> : vector<16x64xf32>
    %201 = tpu.matmul %198, %200, %cst_81 {dimension_numbers = #tpu.dot_dimension_numbers<[1], [0], [0], [1], [0, 0, 1, 1], [], []>} : vector<16x256xbf16>, vector<256x64xbf16>, vector<16x64xf32> -> vector<16x64xf32>
    %c0_82 = arith.constant 0 : index
    %c0_83 = arith.constant 0 : index
    %c0_84 = arith.constant 0 : index
    %202 = vector.load %arg19[%c0_82, %c0_83, %c0_84] : memref<1x1x64xf32, #tpu.memory_space<vmem>>, vector<1x1x64xf32>
    %203 = vector.shape_cast %202 : vector<1x1x64xf32> to vector<1x64xf32>
    %204 = vector.broadcast %203 : vector<1x64xf32> to vector<16x64xf32>
    %205 = arith.addf %201, %204 : vector<16x64xf32>
    %206 = arith.addf %149, %205 : vector<16x64xf32>
    %c0_85 = arith.constant 0 : index
    %c0_86 = arith.constant 0 : index
    %207 = vector.load %arg21[%c0_85, %c0_86] : memref<16x64xf32, #tpu.memory_space<vmem>>, vector<16x64xf32>
    tpu.vector_store %arg21[%c0_85, %c0_86], %206 {strides = array<i32>} : memref<16x64xf32, #tpu.memory_space<vmem>>, vector<16x64xf32>,
    %c1_i32 = arith.constant 1 : i32
    %208 = arith.cmpi eq, %arg0, %c1_i32 : i32
    %209 = arith.extui %208 : i1 to i32
    %c0_i32_87 = arith.constant 0 : i32
    %210 = arith.cmpi ne, %209, %c0_i32_87 : i32
    scf.if %210 {
      %c0_88 = arith.constant 0 : index
      %c0_89 = arith.constant 0 : index
      %211 = vector.load %arg6[%c0_88, %c0_89] : memref<1x64xf32, #tpu.memory_space<vmem>>, vector<1x64xf32>
      %c0_90 = arith.constant 0 : index
      %c0_91 = arith.constant 0 : index
      %212 = vector.load %arg7[%c0_90, %c0_91] : memref<1x64xf32, #tpu.memory_space<vmem>>, vector<1x64xf32>
      %cst_92 = arith.constant dense<0.000000e+00> : vector<16xf32>
      %213 = vector.multi_reduction <add>, %206, %cst_92 [1] : vector<16x64xf32> to vector<16xf32>
      %214 = vector.shape_cast %213 : vector<16xf32> to vector<16x1xf32>
      %cst_93 = arith.constant 6.400000e+01 : f32
      %215 = vector.broadcast %cst_93 : f32 to vector<16x1xf32>
      %216 = arith.divf %214, %215 : vector<16x1xf32>
      %217 = vector.broadcast %216 : vector<16x1xf32> to vector<16x64xf32>
      %218 = arith.subf %206, %217 : vector<16x64xf32>
      %219 = arith.mulf %218, %218 : vector<16x64xf32>
      %cst_94 = arith.constant dense<0.000000e+00> : vector<16xf32>
      %220 = vector.multi_reduction <add>, %219, %cst_94 [1] : vector<16x64xf32> to vector<16xf32>
      %221 = vector.shape_cast %220 : vector<16xf32> to vector<16x1xf32>
      %cst_95 = arith.constant 6.400000e+01 : f32
      %222 = vector.broadcast %cst_95 : f32 to vector<16x1xf32>
      %223 = arith.divf %221, %222 : vector<16x1xf32>
      %224 = vector.broadcast %216 : vector<16x1xf32> to vector<16x64xf32>
      %225 = arith.subf %206, %224 : vector<16x64xf32>
      %cst_96 = arith.constant 9.99999974E-6 : f32
      %226 = vector.broadcast %cst_96 : f32 to vector<16x1xf32>
      %227 = arith.addf %223, %226 : vector<16x1xf32>
      %228 = math.rsqrt %227 : vector<16x1xf32>
      %229 = vector.broadcast %228 : vector<16x1xf32> to vector<16x64xf32>
      %230 = arith.mulf %225, %229 : vector<16x64xf32>
      %231 = vector.broadcast %211 : vector<1x64xf32> to vector<16x64xf32>
      %232 = arith.mulf %230, %231 : vector<16x64xf32>
      %233 = vector.broadcast %212 : vector<1x64xf32> to vector<16x64xf32>
      %234 = arith.addf %232, %233 : vector<16x64xf32>
      %235 = arith.truncf %234 : vector<16x64xf32> to vector<16x64xbf16>
      %c0_97 = arith.constant 0 : index
      %c0_98 = arith.constant 0 : index
      %236 = vector.load %arg20[%c0_97, %c0_98] : memref<16x64xbf16, #tpu.memory_space<vmem>>, vector<16x64xbf16>
      tpu.vector_store %arg20[%c0_97, %c0_98], %235 {strides = array<i32>} : memref<16x64xbf16, #tpu.memory_space<vmem>>, vector<16x64xbf16>,
    } else {
    }
    return
  }
  func.func @transform_0(%arg0: i32) -> (i32, i32) {
    %c0_i32 = arith.constant 0 : i32
    %c0_i32_0 = arith.constant 0 : i32
    %c0_i32_1 = arith.constant 0 : i32
    return %c0_i32, %c0_i32_0 : i32, i32
  }
  func.func @transform_1(%arg0: i32) -> (i32, i32) {
    %c0_i32 = arith.constant 0 : i32
    %c0_i32_0 = arith.constant 0 : i32
    %c0_i32_1 = arith.constant 0 : i32
    return %c0_i32, %c0_i32_0 : i32, i32
  }
  func.func @transform_2(%arg0: i32) -> (i32, i32) {
    %c0_i32 = arith.constant 0 : i32
    %c0_i32_0 = arith.constant 0 : i32
    %c0_i32_1 = arith.constant 0 : i32
    return %c0_i32, %c0_i32_0 : i32, i32
  }
  func.func @transform_3(%arg0: i32) -> (i32, i32) {
    %c0_i32 = arith.constant 0 : i32
    %c0_i32_0 = arith.constant 0 : i32
    %c0_i32_1 = arith.constant 0 : i32
    return %c0_i32, %c0_i32_0 : i32, i32
  }
  func.func @transform_4(%arg0: i32) -> (i32, i32) {
    %c0_i32 = arith.constant 0 : i32
    %c0_i32_0 = arith.constant 0 : i32
    %c0_i32_1 = arith.constant 0 : i32
    return %c0_i32, %c0_i32_0 : i32, i32
  }
  func.func @transform_5(%arg0: i32) -> (i32, i32) {
    %c0_i32 = arith.constant 0 : i32
    %c0_i32_0 = arith.constant 0 : i32
    %c0_i32_1 = arith.constant 0 : i32
    return %c0_i32, %c0_i32_0 : i32, i32
  }
  func.func @transform_6(%arg0: i32) -> (i32, i32) {
    %c0_i32 = arith.constant 0 : i32
    %c0_i32_0 = arith.constant 0 : i32
    %c0_i32_1 = arith.constant 0 : i32
    return %c0_i32, %c0_i32_0 : i32, i32
  }
  func.func @transform_7(%arg0: i32) -> (i32, i32, i32) {
    %c0_i32 = arith.constant 0 : i32
    %c0_i32_0 = arith.constant 0 : i32
    %c0_i32_1 = arith.constant 0 : i32
    return %arg0, %c0_i32, %c0_i32_0 : i32, i32, i32
  }
  func.func @transform_8(%arg0: i32) -> (i32, i32, i32) {
    %c0_i32 = arith.constant 0 : i32
    %c0_i32_0 = arith.constant 0 : i32
    %c0_i32_1 = arith.constant 0 : i32
    return %arg0, %c0_i32, %c0_i32_0 : i32, i32, i32
  }
  func.func @transform_9(%arg0: i32) -> (i32, i32, i32) {
    %c0_i32 = arith.constant 0 : i32
    %c0_i32_0 = arith.constant 0 : i32
    %c0_i32_1 = arith.constant 0 : i32
    return %arg0, %c0_i32, %c0_i32_0 : i32, i32, i32
  }
  func.func @transform_10(%arg0: i32) -> (i32, i32, i32) {
    %c0_i32 = arith.constant 0 : i32
    %c0_i32_0 = arith.constant 0 : i32
    %c0_i32_1 = arith.constant 0 : i32
    return %arg0, %c0_i32, %c0_i32_0 : i32, i32, i32
  }
  func.func @transform_11(%arg0: i32) -> (i32, i32, i32) {
    %c0_i32 = arith.constant 0 : i32
    %c0_i32_0 = arith.constant 0 : i32
    %c0_i32_1 = arith.constant 0 : i32
    return %arg0, %c0_i32, %c0_i32_0 : i32, i32, i32
  }
  func.func @transform_12(%arg0: i32) -> (i32, i32, i32) {
    %c0_i32 = arith.constant 0 : i32
    %c0_i32_0 = arith.constant 0 : i32
    %c0_i32_1 = arith.constant 0 : i32
    return %arg0, %c0_i32, %c0_i32_0 : i32, i32, i32
  }
  func.func @transform_13(%arg0: i32) -> (i32, i32, i32) {
    %c0_i32 = arith.constant 0 : i32
    %c0_i32_0 = arith.constant 0 : i32
    %c0_i32_1 = arith.constant 0 : i32
    return %arg0, %c0_i32, %c0_i32_0 : i32, i32, i32
  }
  func.func @transform_14(%arg0: i32) -> (i32, i32, i32) {
    %c0_i32 = arith.constant 0 : i32
    %c0_i32_0 = arith.constant 0 : i32
    %c0_i32_1 = arith.constant 0 : i32
    return %arg0, %c0_i32, %c0_i32_0 : i32, i32, i32
  }
  func.func @transform_15(%arg0: i32) -> (i32, i32, i32) {
    %c0_i32 = arith.constant 0 : i32
    %c0_i32_0 = arith.constant 0 : i32
    %c0_i32_1 = arith.constant 0 : i32
    return %arg0, %c0_i32, %c0_i32_0 : i32, i32, i32
  }
  func.func @transform_16(%arg0: i32) -> (i32, i32, i32) {
    %c0_i32 = arith.constant 0 : i32
    %c0_i32_0 = arith.constant 0 : i32
    %c0_i32_1 = arith.constant 0 : i32
    return %arg0, %c0_i32, %c0_i32_0 : i32, i32, i32
  }
  func.func @transform_17(%arg0: i32) -> (i32, i32, i32) {
    %c0_i32 = arith.constant 0 : i32
    %c0_i32_0 = arith.constant 0 : i32
    %c0_i32_1 = arith.constant 0 : i32
    return %arg0, %c0_i32, %c0_i32_0 : i32, i32, i32
  }
  func.func @transform_18(%arg0: i32) -> (i32, i32, i32) {
    %c0_i32 = arith.constant 0 : i32
    %c0_i32_0 = arith.constant 0 : i32
    %c0_i32_1 = arith.constant 0 : i32
    return %arg0, %c0_i32, %c0_i32_0 : i32, i32, i32
  }
  func.func @transform_19(%arg0: i32) -> (i32, i32) {
    %c0_i32 = arith.constant 0 : i32
    %c0_i32_0 = arith.constant 0 : i32
    %c0_i32_1 = arith.constant 0 : i32
    return %c0_i32, %c0_i32_0 : i32, i32
  }
}

</mosaic_0001>

<bundles_post_ra>
// kernel: tile.11
= control target key start
LH: loop header
LB: loop body
LE: loop exit
PB: predicated region body
PF: predicated region fallthrough
CT: control target
= control target key end

     0   :  { %vm7_vm0 = vcmask 64512   ;;  %vm13_vm1 = vcmask 130112   ;;  %s39_s0 = inlined_call_operand.vmem [shape: s32[2,8], index: 0, kind: input, shape index: {}]   ;;  %s40_s1 = inlined_call_operand.vmem [shape: s32[1,16], index: 1, kind: output, shape index: {}]  }
   0x1   :  { %v4_v0 = vld [vmem:[%s39_s0] sm:$0x3]  ;;  %s22_s0 = smov 8  }
   0x2   :  { %5 = vst [vmem:[#allocation1] sm:$0x3] %v4_v0 }
   0x9   :  { %v10_v1 = vld [vmem:[#allocation1 + $0x1] sm:$0x1]   ;;  %v6_v2 = vld [vmem:[#allocation1] sm:$0x1]  }
   0xa   :  { %11 = vrot.lane.b32.xlu0 %v10_v1, %s22_s0  ;;  %8 = vst.msk [vmem:[#allocation0] sm:$0x1] %vm7_vm0, %v6_v2  }
  0x7c   :  { %v12_v3 = vpop.permute.xlu0 %11  }
  0x7d   :  { %14 = vst.msk [vmem:[#allocation0] sm:$0x1] %vm13_vm1, %v12_v3  }
  0x84   :  { %v18_v4 = vld [vmem:[#allocation0] sm:$0x1] }
  0x85   :  { %20 = vst [vmem:[%s40_s1] sm:$0x1] %v18_v4 }

// kernel: chatbot_forward.3
= control target key start
LH: loop header
LB: loop body
LE: loop exit
PB: predicated region body
PF: predicated region fallthrough
CT: control target
= control target key end

     0   :  { %v172_v1 = vmov 0.0   ;;  %vm173_vm0 = vmmov 0   ;;  %s219_s0 = inlined_call_operand.vmem [shape: bf16[16,64], index: 0, kind: input, shape index: {}]   ;;  %s220_s1 = inlined_call_operand.vmem [shape: bf16[64,128], index: 1, kind: input, shape index: {}]   ;;  %s221_s2 = inlined_call_operand.hbm [shape: f32[16,128], index: 2, kind: output, shape index: {}]  }
   0x1   :  { %v143_v0 = vld [vmem:[%s220_s1] sm:$0xff]   ;;  %126 = vmatprep.subr.bf16.mxu0 %v172_v1  ;;  %v144_v2 = vld [vmem:[%s220_s1 + $0x8] sm:$0xff]   ;;  %134 = vmatprep.mubr.msk.bf16.mxu0 %vm173_vm0, %v172_v1 }
   0x2   :  { %127 = vmatpush3.bf16.msra.mxu0 %v143_v0 }
   0x3   :  { %128 = vmatprep.subr.bf16.mxu0 %v172_v1 }
   0x4   :  { %7 = vsyncpa [#allocation3], 0  ;;  %v145_v3 = vld [vmem:[%s220_s1 + $0x10] sm:$0xff]   ;;  %v146_v4 = vld [vmem:[%s220_s1 + $0x18] sm:$0xff]   ;;  %vm52_vm1 = vcmask 523264   ;;  %s174_s19 = smov [#allocation2]  }
   0x5   :  { %v147_v5 = vld [vmem:[%s219_s0] sm:$0xff]   ;;  %s104_s20 = sshll.u32 %s174_s19, 4  ;;  %s105_s20 = int_to_ptr.vmem [resolvable:$true] %s104_s20 }
   0x6   :  { %129 = vmatpush3.bf16.msra.mxu0 %v144_v2  ;;  %s148_s21 = scalar_lea.vmem %s105_s20, 256  ;;  %p153_p1 = scmp.lt.s32.totalorder %s105_s20, %s105_s20 }
   0x7   :  { %130 = vmatprep.subr.bf16.mxu0 %v172_v1  ;;  %p149_p0 = scmp.ne.s32.totalorder %s105_s20, %s148_s21  ;;  %p154_p2 = scmp.lt.s32.totalorder %s148_s21, %s148_s21 }
   0x9   :  { %p155_p3 = por %p154_p2, %p153_p1 }
   0xa   :  { %131 = vmatpush3.bf16.msra.mxu0 %v145_v3 }
   0xb   :  { %132 = vmatprep.subr.bf16.mxu0 %v172_v1  ;;  %p156_p4 = pnand %p155_p3, %p149_p0 }
   0xe   :  { %133 = vmatpush3.bf16.msra.mxu0 %v146_v4 }
  0x11   :  { %135 = vmatmul.mubr.msk.bf16.vlgmr.msra.gmra.mrb[0].mxu0 %vm52_vm1, %v147_v5 }
  0xe4   :  { %v90_v6 = vpop.f32.mrb[0].mxu0 }
  0xe5   :  { %97 = vst [vmem:[#allocation2] sm:$0xff] %v90_v6  ;;  %v136_v7 = vpop.f32.mrb[1].mxu0 }
  0xe6   :  { %v93_v8 = vpop.f32.mrb[2].mxu0 }
  0xe7   :  { %98 = vst [vmem:[#allocation2 + $0x8] sm:$0xff] %v93_v8  ;;  %v137_v9 = vpop.f32.mrb[3].mxu0 }
  0xe8   :  { %159 = shalt.err (!%p156_p4)
}
  0xe9   :  { %s160_s22 = scalar_lea.hbm %s221_s2, 256 }
  0xea   :  { %p161_p5 = scmp.ne.s32.totalorder %s221_s2, %s160_s22  ;;  %p164_p6 = scmp.lt.u32.totalorder %s160_s22, %s221_s2 }
  0xec   :  { %p166_p7 = pnand %p164_p6, %p161_p5 }
  0xee   :  { %169 = shalt.err (!%p166_p7)
}
  0xef   :  { %s175_s27 = smov 128   ;;  %s176_s28 = smov 8  }
  0xf0   :  { %110 = dma.vmem_to_hbm [thread:$0]  %s105_s20, 256, %s221_s2, [#allocation3], %s175_s27, %s175_s27, %s176_s28  }
  0xf1   :  { %170 = dma.done.wait [#allocation3], 256  }
  0xf2   :  { %171 = vsyncadd [#allocation3], 4294967040 }
  0xf3   :  { %114 = vsyncpa [#allocation3], 1 }

// kernel: chatbot_forward.2
= control target key start
LH: loop header
LB: loop body
LE: loop exit
PB: predicated region body
PF: predicated region fallthrough
CT: control target
= control target key end

     0   :  { %s2902_s0 = inlined_call_operand.vmem [shape: f32[16,64], index: 0, kind: input, shape index: {}]   ;;  %s2903_s1 = inlined_call_operand.vmem [shape: s32[16,1], index: 1, kind: input, shape index: {}]   ;;  %s2904_s2 = inlined_call_operand.vmem [shape: s32[1,16], index: 2, kind: input, shape index: {}]   ;;  %s2905_s3 = inlined_call_operand.vmem [shape: s32[16,1], index: 3, kind: input, shape index: {}]   ;;  %s2906_s4 = inlined_call_operand.vmem [shape: s32[1,16], index: 4, kind: input, shape index: {}]   ;;  %s2907_s5 = inlined_call_operand.vmem [shape: f32[1,64], index: 5, kind: input, shape index: {}]   ;;  %s2908_s6 = inlined_call_operand.vmem [shape: f32[1,64], index: 6, kind: input, shape index: {}]   ;;  %s2909_s7 = inlined_call_operand.vmem [shape: f32[2,1,64], index: 7, kind: input, shape index: {}, may-alias: {7,13}]   ;;  %s2910_s8 = inlined_call_operand.vmem [shape: f32[2,1,64], index: 8, kind: input, shape index: {}, may-alias: {8,12,14,18}]   ;;  %s2911_s9 = inlined_call_operand.vmem [shape: bf16[2,64,192], index: 9, kind: input, shape index: {}]   ;;  %s2912_s10 = inlined_call_operand.vmem [shape: f32[2,1,192], index: 10, kind: input, shape index: {}]   ;;  %s2913_s11 = inlined_call_operand.vmem [shape: bf16[2,64,64], index: 11, kind: input, shape index: {}]   ;;  %s2914_s12 = inlined_call_operand.vmem [shape: f32[2,1,64], index: 12, kind: input, shape index: {}, may-alias: {8,12,14,18}]   ;;  %s2915_s13 = inlined_call_operand.vmem [shape: f32[2,1,64], index: 13, kind: input, shape index: {}, may-alias: {7,13}]   ;;  %s2916_s14 = inlined_call_operand.vmem [shape: f32[2,1,64], index: 14, kind: input, shape index: {}, may-alias: {8,12,14,18}]   ;;  %s2917_s15 = inlined_call_operand.vmem [shape: bf16[2,64,256], index: 15, kind: input, shape index: {}]   ;;  %s2918_s16 = inlined_call_operand.vmem [shape: f32[2,1,256], index: 16, kind: input, shape index: {}]   ;;  %s2919_s17 = inlined_call_operand.vmem [shape: bf16[2,256,64], index: 17, kind: input, shape index: {}]   ;;  %s2920_s18 = inlined_call_operand.vmem [shape: f32[2,1,64], index: 18, kind: input, shape index: {}, may-alias: {8,12,14,18}]   ;;  %s2921_s19 = inlined_call_operand.vmem [shape: bf16[16,64], index: 19, kind: output, shape index: {}]  }
   0x1   :  { %2928 = sst [smem:[#allocation4_spill]] %s2902_s0  ;;  %s2590_s0 = smov 0  }
   0x2   :  { %2929 = sst [smem:[#allocation5_spill]] %s2903_s1 }
   0x3   :  { %2930 = sst [smem:[#allocation6_spill]] %s2904_s2 }
   0x4   :  { %2931 = sst [smem:[#allocation7_spill]] %s2905_s3 }
   0x5   :  { %2932 = sst [smem:[#allocation8_spill]] %s2906_s4 }
   0x6   :  { %2933 = sst [smem:[#allocation9_spill]] %s2907_s5 }
   0x7   :  { %2934 = sst [smem:[#allocation10_spill]] %s2908_s6 }
   0x8   :  { %2935 = sst [smem:[#allocation11_spill]] %s2910_s8 }
   0x9   :  { %2936 = sst [smem:[#allocation12_spill]] %s2911_s9 }
   0xa   :  { %2937 = sst [smem:[#allocation13_spill]] %s2912_s10 }
   0xb   :  { %2938 = sst [smem:[#allocation14_spill]] %s2921_s19 }
   0xc LB: > { %2939 = sst [smem:[#allocation3_spill]] %s2477_s0  ;;  %s2596_s30 = sadd.s32 4294967295, %s2477_s0   ;;  %s2477_s0 = sphi %s2590_s0, %s29_s0  }
   0xd   : > { %p2156_p0 = scmp.ge.s32.totalorder %s2477_s0, 1  ;;  %p628_p1 = scmp.lt.s32.totalorder %s2477_s0, 3 }
   0xf   : > { %p629_p2 = pnand %p2156_p0, %p628_p1 }
  0x10   : > { %p720_p3 = scmp.lt.s32.totalorder (!%p629_p2), %s2596_s30, 1  ;;  %s2941_s9 = sld [smem:[#allocation12_spill]] (!%p629_p2) }
  0x11   : > { %632 = sbr.rel (%p629_p2) target bundleno = 2952 (0xb88), region = 96  ;;  %s2942_s10 = sld [smem:[#allocation13_spill]] (!%p629_p2) }
  0x12   : > { %p2167_p4 = scmp.ne.s32.totalorder (!%p629_p2), %s2596_s30, 0 }
  0x18   : > { %s2602_s20 = scalar_select %p720_p3, %s2596_s30, 1 }
  0x19   : > { %770 = sbr.rel (%p2167_p4) target bundleno = 33 (0x21), region = 100  ;;  %s2943_s27 = sld [smem:[#allocation4_spill]] (!%p2167_p4)  ;;  %vm773_vm0 = vcmask (!%p2167_p4), 523264  }
  0x1a   : > { %s2230_s25 = sshll.u32 %s2602_s20, 6  ;;  %s2159_s3 = sshll.u32 %s2602_s20, 1 }
  0x1b   : > { %s2617_s28 = scalar_lea.vmem %s2941_s9, %s2230_s25  ;;  %s2622_s1 = scalar_lea.vmem %s2942_s10, %s2159_s3 }
  0x1c   : > { %s2231_s0 = sshll.u32 %s2602_s20, 5  ;;  %s2645_s8 = scalar_lea.vmem %s2917_s15, %s2230_s25 }
  0x1d   : > { %s2632_s23 = scalar_lea.vmem %s2913_s11, %s2231_s0  ;;  %s2650_s22 = scalar_lea.vmem %s2918_s16, %s2159_s3 }
  0x1e   : > { %s2233_s5 = sshll.u32 %s2602_s20, 7 }
  0x1f   : > { %s2656_s4 = scalar_lea.vmem %s2919_s17, %s2233_s5  ;;  %v771_v0 = vld [vmem:[%s2943_s27] sm:$0xff] (!%p2167_p4)  ;;  %v772_v1 = vld [vmem:[%s2943_s27 + $0x8] sm:$0xff] (!%p2167_p4) }
  0x20   : > { %774 = vst.msk [vmem:[#allocation2] sm:$0xff] %vm773_vm0, %v771_v0  ;;  %775 = vst.msk [vmem:[#allocation2 + $0x8] sm:$0xff] %vm773_vm0, %v772_v1 }
  0x21 PF: > { %vm814_vm1 = vcmask 523264   ;;  %v2375_v16 = vld [vmem:[%s2617_s28 + $0x4] ss:$8 sps:$4 sm:$0xff]   ;;  %v2377_v17 = vld [vmem:[%s2617_s28] ss:$8 sps:$4 sm:$0xff]   ;;  %v2479_v24 = vmov 0   ;;  %s2944_s6 = scalar_lea.vmem %s2909_s7, %s2602_s20  ;;  %v869_v42 = vlaneseq  ;;  %s2954_s29 = scalar_lea.vmem %s2916_s14, %s2602_s20 }
  0x22   : > { %922 = vmatprep.subr.bf16.mxu1 %v2375_v16  ;;  %v2378_v18 = vld [vmem:[%s2617_s28 + $0x14] ss:$8 sps:$4 sm:$0xff]   ;;  %v2380_v19 = vld [vmem:[%s2617_s28 + $0x10] ss:$8 sps:$4 sm:$0xff]   ;;  %v2381_v20 = vld [vmem:[%s2617_s28 + $0x24] ss:$8 sps:$4 sm:$0xff]   ;;  %954 = vmatprep.mubr.bf16.mxu1 %v2479_v24 }
  0x23   : > { %923 = vmatpush1.bf16.msra.mxu1 %v2377_v17  ;;  %v2383_v21 = vld [vmem:[%s2617_s28 + $0x20] ss:$8 sps:$4 sm:$0xff]   ;;  %v2384_v22 = vld [vmem:[%s2617_s28 + $0x34] ss:$8 sps:$4 sm:$0xff]   ;;  %v2386_v23 = vld [vmem:[%s2617_s28 + $0x30] ss:$8 sps:$4 sm:$0xff]   ;;  %2358 = vset.pattern.permute.xlu1 %v2479_v24 }
  0x24   : > { %924 = vmatprep.subr.bf16.mxu1 %v2378_v18  ;;  %2359 = vset.pattern.permute.xlu0 %v2479_v24  ;;  %v2170_v33 = vld [vmem:[%s2944_s6] ss:$0 sm:$0xff]  ;;  %s2945_s0 = sld [smem:[#allocation11_spill]]  ;;  %v2703_v43 = vshrl.u32 %v869_v42, 7  ;;  %v2480_v44 = vmov 0.0   ;;  %vm2481_vm2 = vmmov 0  }
  0x25   : > { %2291 = vmatprep.subr.bf16.mxu0 %v2480_v44  ;;  %v867_v46 = vld [vmem:[%s2622_s1] sm:$0x3]  ;;  %2293 = vmatprep.mubr.msk.bf16.mxu0 %vm2481_vm2, %v2480_v44  ;;  %s2927_s1 = smov 48   ;;  %s2483_s24 = smov 64   ;;  %vm970_vm3 = vcmask 130048   ;;  %vm1491_vm10 = vcmask 261120  }
  0x26   : > { %v871_v45 = vsub.s32 0, %v2703_v43  ;;  %v875_v47 = vsub.s32 1, %v2703_v43  ;;  %s2484_s10 = smov 112   ;;  %s2485_s25 = smov 96   ;;  %vm1494_vm11 = vcmask 392192  }
  0x27   : > { %v2669_v2 = vld [vmem:[#allocation2] sm:$0xff]  ;;  %v2671_v3 = vld [vmem:[#allocation2 + $0x8] sm:$0xff]  ;;  %925 = vmatpush1.bf16.msra.mxu1 %v2380_v19  ;;  %s2486_s3 = smov 32   ;;  %s2487_s21 = smov 80  }
  0x28   : > { %v815_v4 = vsel %vm814_vm1, %v2669_v2, 0.0  ;;  %v818_v5 = vsel %vm814_vm1, %v2671_v3, 0.0  ;;  %926 = vmatprep.subr.bf16.mxu1 %v2381_v20  ;;  %v872_v48 = vrot.slane %v867_v46, %v871_v45  ;;  %v876_v50 = vrot.slane %v867_v46, %v875_v47  ;;  %s2488_s28 = smov 16   ;;  %s2947_s19 = sld [smem:[#allocation5_spill]] }
  0x29   : > { %816 = vadd.xlane.f32.xlu0 %v815_v4  ;;  %s2948_s9 = sld [smem:[#allocation7_spill]]  ;;  %s2949_s26 = sld [smem:[#allocation6_spill]] }
  0x2a   : > { %s2946_s2 = scalar_lea.vmem %s2945_s0, %s2602_s20  ;;  %s2950_s0 = sld [smem:[#allocation8_spill]] }
  0x2b   : > { %927 = vmatpush1.bf16.msra.mxu1 %v2383_v21  ;;  %v2171_v37 = vld [vmem:[%s2946_s2] ss:$0 sm:$0xff]  ;;  %p2223_p5 = scmp.ne.s32.totalorder %s2596_s30, 1 }
  0x2c   : > { %928 = vmatprep.subr.bf16.mxu1 %v2384_v22  ;;  %vm2008_vm12 = vcmask (!%p2223_p5), 519168  }
  0x2d   : > { %819 = vadd.xlane.f32.xlu0 %v818_v5 }
  0x2e   : > { %v779_v60 = vld [vmem:[%s2947_s19 + $0x8] sm:$0xff]  ;;  %v778_v61 = vld [vmem:[%s2947_s19] sm:$0xff] }
  0x2f   : > { %929 = vmatpush1.bf16.msra.mxu1 %v2386_v23  ;;  %v793_v62 = vld [vmem:[%s2948_s9] sm:$0xff]  ;;  %v794_v63 = vld [vmem:[%s2948_s9 + $0x8] sm:$0xff] }
  0x30   : > { %2279 = vmatprep.subr.bf16.mxu1 %v2480_v44  ;;  %v2169_v16 = vld [vmem:[%s2950_s0] ss:$0 sm:$0xff]  ;;  %s2957_s0 = sld [smem:[#allocation10_spill]] (!%p2223_p5) }
  0xb6   : > { %v817_v6 = vpop.xlane.xlu0 %816 }
  0xb7   : > { %v822_v7 = vmul.f32 0.015625, %v817_v6 }
  0xb9   : > { %v824_v8 = vsub.f32 %v2669_v2, %v822_v7 }
  0xba   : > { %v820_v9 = vpop.xlane.xlu0 %819 }
  0xbb   : > { %v823_v10 = vmul.f32 0.015625, %v820_v9  ;;  %v826_v11 = vmul.f32 %v824_v8, %v824_v8 }
  0xbd   : > { %v825_v12 = vsub.f32 %v2671_v3, %v823_v10  ;;  %v828_v13 = vsel %vm814_vm1, %v826_v11, 0.0 }
  0xbe   : > { %829 = vadd.xlane.f32.xlu1 %v828_v13 }
  0xbf   : > { %v827_v14 = vmul.f32 %v825_v12, %v825_v12 }
  0xc1   : > { %v831_v15 = vsel %vm814_vm1, %v827_v14, 0.0 }
  0xc2   : > { %832 = vadd.xlane.f32.xlu1 %v831_v15  ;;  %v2168_v15 = vld [vmem:[%s2949_s26] ss:$0 sm:$0xff]  ;;  %s2956_s26 = sld [smem:[#allocation9_spill]] (!%p2223_p5) }
 0x14b   : > { %v830_v25 = vpop.xlane.xlu1 %829 }
 0x14c   : > { %v834_v26 = vmul.f32 0.015625, %v830_v25 }
 0x14e   : > { %v836_v27 = vadd.f32 1e-05, %v834_v26  ;;  %v2489_v26 = vmov -1e+09  }
 0x14f   : > { %v833_v28 = vpop.xlane.xlu1 %832 }
 0x150   : > { %2419 = vrsqrt.f32 %v836_v27  ;;  %v835_v29 = vmul.f32 0.015625, %v833_v28 }
 0x152   : > { %v837_v30 = vadd.f32 1e-05, %v835_v29 }
 0x154   : > { %2421 = vrsqrt.f32 %v837_v30 }
 0x15a   : > { %v2420_v31 = vpop.eup %2419 }
 0x15b   : > { %v840_v32 = vmul.f32 %v2420_v31, %v824_v8 }
 0x15d   : > { %v848_v36 = vmul.f32 %v2170_v33, %v840_v32 }
 0x15e   : > { %v2422_v34 = vpop.eup %2421 }
 0x15f   : > { %v841_v35 = vmul.f32 %v2422_v34, %v825_v12  ;;  %v856_v39 = vadd.f32 %v2171_v37, %v848_v36 }
 0x161   : > { %v849_v38 = vmul.f32 %v2170_v33, %v841_v35 }
 0x163   : > { %v857_v40 = vadd.f32 %v2171_v37, %v849_v38 }
 0x165   : > { %v858_v41 = vpack.c.bf16 %v857_v40, %v856_v39 }
 0x167   : > { %2180 = vmatmul.mubr.msk.bf16.vlgmr.msra.gmra.mrb[0].mxu1 %vm814_vm1, %v858_v41 }
 0x168   : > { %2281 = vmatprep.mubr.msk.bf16.mxu1 %vm2481_vm2, %v2480_v44 }
 0x23a   : > { %v956_v49 = vpop.f32.mrb[0].mxu1 }
 0x23b   : > { %v958_v51 = vpop.f32.mrb[1].mxu1  ;;  %v957_v53 = vadd.f32 %v956_v49, %v872_v48 }
 0x23c   : > { %v960_v52 = vpop.f32.mrb[2].mxu1  ;;  %v959_v56 = vadd.f32 %v958_v51, %v876_v50 }
 0x23d   : > { %v961_v54 = vadd.f32 %v960_v52, %v872_v48  ;;  %v962_v55 = vpop.f32.mrb[3].mxu1 }
 0x23e   : > { %v963_v57 = vadd.f32 %v962_v55, %v876_v50 }
 0x23f   : > { %v965_v58 = vpack.c.bf16 %v961_v54, %v957_v53 }
 0x240   : > { %v2718_v59 = vpack.c.bf16 %v963_v57, %v959_v56 }
 0x241   : > { %1091 = vrot.lane.b32.xlu1 %v965_v58, %s2927_s1  ;;  %968 = vrot.lane.b32.xlu0 %v965_v58, %s2483_s24  ;;  %s2955_s1 = scalar_lea.vmem %s2920_s18, %s2602_s20 }
 0x245   : > { %1089 = vrot.lane.b32.xlu1 %v965_v58, %s2484_s10  ;;  %1215 = vrot.lane.b32.xlu0 %v965_v58, %s2485_s25 }
 0x249   : > { %1217 = vrot.lane.b32.xlu1 %v965_v58, %s2486_s3  ;;  %1340 = vrot.lane.b32.xlu0 %v965_v58, %s2487_s21 }
 0x24d   : > { %1342 = vrot.lane.b32.xlu1 %v965_v58, %s2488_s28  ;;  %785 = vperm.xlu0 %2359, %v779_v60  }
 0x251   : > { %782 = vperm.xlu1 %2358, %v778_v61  }
 0x255   : > { %797 = vperm.xlu1 %2358, %v793_v62  }
 0x259   : > { %800 = vperm.xlu1 %2358, %v794_v63  }
 0x2b3   : > { %v1092_v0 = vpop.permute.xlu1 %1091  ;;  %v969_v1 = vpop.permute.xlu0 %968 }
 0x2b4   : > { %v975_v4 = vsel %vm970_vm3, %v969_v1, 0  ;;  %v1097_v5 = vsel %vm970_vm3, %v1092_v0, 0 }
 0x2b5   : > { %2280 = vmatpush3.bf16.xpose.msra.mxu1 %v975_v4  ;;  %2292 = vmatpush3.bf16.xpose.msra.mxu0 %v1097_v5 }
 0x2b6   : > { %2285 = vmatprep.subr.bf16.mxu1 %v2480_v44  ;;  %2303 = vmatprep.subr.bf16.mxu0 %v2480_v44 }
 0x2b7   : > { %v1090_v6 = vpop.permute.xlu1 %1089  ;;  %v1216_v10 = vpop.permute.xlu0 %1215 }
 0x2bb   : > { %v1218_v7 = vpop.permute.xlu1 %1217  ;;  %v1341_v12 = vpop.permute.xlu0 %1340 }
 0x2bc   : > { %v1223_v8 = vsel %vm970_vm3, %v1218_v7, 0  ;;  %2282 = vmatmul.mubr.msk.bf16.vlgmr.msra.gmra.mrb[4].mxu1 %vm970_vm3, %v965_v58  ;;  %2294 = vmatmul.mubr.msk.bf16.vlgmr.msra.gmra.mrb[0].mxu0 %vm970_vm3, %v1090_v6 }
 0x2bd   : > { %2286 = vmatpush3.bf16.msra.mxu1 %v2718_v59  ;;  %2304 = vmatpush3.bf16.xpose.msra.mxu0 %v1223_v8 }
 0x2be   : > { %2305 = vmatprep.mubr.msk.bf16.mxu0 %vm2481_vm2, %v2480_v44  ;;  %2315 = vmatprep.subr.bf16.mxu0 %v2480_v44 }
 0x2bf   : > { %2287 = vmatprep.mubr.msk.bf16.mxu1 %vm2481_vm2, %v2480_v44  ;;  %2297 = vmatprep.subr.bf16.mxu1 %v2480_v44  ;;  %v1343_v9 = vpop.permute.xlu1 %1342 }
 0x2c0   : > { %v1348_v11 = vsel %vm970_vm3, %v1343_v9, 0 }
 0x2c4   : > { %2306 = vmatmul.mubr.msk.bf16.vlgmr.msra.gmra.mrb[4].mxu0 %vm970_vm3, %v1216_v10 }
 0x2c5   : > { %2316 = vmatpush3.bf16.xpose.msra.mxu0 %v1348_v11  ;;  %2317 = vmatprep.mubr.msk.bf16.mxu0 %vm2481_vm2, %v2480_v44 }
 0x2c6   : > { %2327 = vmatprep.subr.bf16.mxu0 %v2480_v44 }
 0x2cc   : > { %2318 = vmatmul.mubr.msk.bf16.vlgmr.msra.gmra.mrb[8].mxu0 %vm970_vm3, %v1341_v12  ;;  %v786_v18 = vpop.permute.xlu0 %785 }
 0x2cd   : > { %2335 = vmatprep.mubr.msk.bf16.mxu0 %vm2481_vm2, %v2480_v44  ;;  %vm792_vm7 = vcmp.eq.s32.totalorder %v786_v18, %v2168_v15 }
 0x2d0   : > { %v783_v13 = vpop.permute.xlu1 %782 }
 0x2d1   : > { %vm791_vm4 = vcmp.eq.s32.totalorder %v783_v13, %v2168_v15 }
 0x2d4   : > { %v798_v14 = vpop.permute.xlu1 %797 }
 0x2d5   : > { %vm806_vm5 = vcmp.ge.s32.totalorder %v798_v14, %v2169_v16 }
 0x2d6   : > { %vm808_vm8 = vmand %vm791_vm4, %vm806_vm5 }
 0x2d7   : > { %v810_v27 = vsel %vm808_vm8, 0.0, %v2489_v26 }
 0x2d8   : > { %v801_v17 = vpop.permute.xlu1 %800 }
 0x2d9   : > { %vm807_vm6 = vcmp.ge.s32.totalorder %v801_v17, %v2169_v16 }
 0x2da   : > { %vm809_vm9 = vmand %vm792_vm7, %vm807_vm6 }
 0x2db   : > { %v811_v34 = vsel %vm809_vm9, 0.0, %v2489_v26 }
 0x38f   : > { %v1011_v19 = vpop.f32.mrb[4].mxu1  ;;  %v1133_v20 = vpop.f32.mrb[0].mxu0 }
 0x390   : > { %v1018_v21 = vmul.f32 0.25, %v1011_v19  ;;  %v1140_v22 = vmul.f32 0.25, %v1133_v20  ;;  %v2283_v23 = vpop.f32.mrb[5].mxu1  ;;  %v2295_v25 = vpop.f32.mrb[1].mxu0 }
 0x391   : > { %v1014_v28 = vpop.f32.mrb[6].mxu1  ;;  %v1136_v29 = vpop.f32.mrb[2].mxu0 }
 0x392   : > { %v1019_v30 = vmul.f32 0.25, %v1014_v28  ;;  %v2284_v31 = vpop.f32.mrb[7].mxu1  ;;  %v2296_v32 = vpop.f32.mrb[3].mxu0  ;;  %v1020_v33 = vadd.f32 %v1018_v21, %v810_v27  ;;  %v1141_v35 = vmul.f32 0.25, %v1136_v29  ;;  %v1142_v38 = vadd.f32 %v1140_v22, %v810_v27 }
 0x394   : > { %v1022_v36 = vsel %vm970_vm3, %v1020_v33, -inf  ;;  %v1021_v37 = vadd.f32 %v1019_v30, %v811_v34  ;;  %v1144_v46 = vsel %vm970_vm3, %v1142_v38, -inf  ;;  %v1143_v48 = vadd.f32 %v1141_v35, %v811_v34 }
 0x395   : > { %1023 = vmax.xlane.f32.xlu0 %v1022_v36 }
 0x396   : > { %v1025_v39 = vsel %vm970_vm3, %v1021_v37, -inf  ;;  %v1147_v52 = vsel %vm970_vm3, %v1143_v48, -inf }
 0x397   : > { %v1259_v40 = vpop.f32.mrb[4].mxu0  ;;  %1026 = vmax.xlane.f32.xlu1 %v1025_v39 }
 0x398   : > { %v1266_v41 = vmul.f32 0.25, %v1259_v40  ;;  %v2307_v42 = vpop.f32.mrb[5].mxu0 }
 0x399   : > { %1145 = vmax.xlane.f32.xlu0 %v1144_v46  ;;  %v1262_v49 = vpop.f32.mrb[6].mxu0 }
 0x39a   : > { %v1267_v50 = vmul.f32 0.25, %v1262_v49  ;;  %v2308_v51 = vpop.f32.mrb[7].mxu0  ;;  %v1268_v54 = vadd.f32 %v1266_v41, %v810_v27 }
 0x39c   : > { %v1269_v53 = vadd.f32 %v1267_v50, %v811_v34  ;;  %v1270_v60 = vsel %vm970_vm3, %v1268_v54, -inf }
 0x39d   : > { %1148 = vmax.xlane.f32.xlu0 %v1147_v52 }
 0x39e   : > { %v1273_v55 = vsel %vm970_vm3, %v1269_v53, -inf }
 0x39f   : > { %v1384_v56 = vpop.f32.mrb[8].mxu0  ;;  %1274 = vmax.xlane.f32.xlu1 %v1273_v55 }
 0x3a0   : > { %v1391_v57 = vmul.f32 0.25, %v1384_v56  ;;  %v2319_v58 = vpop.f32.mrb[9].mxu0 }
 0x3a1   : > { %v1387_v61 = vpop.f32.mrb[10].mxu0  ;;  %1271 = vmax.xlane.f32.xlu0 %v1270_v60 }
 0x3a2   : > { %v1392_v62 = vmul.f32 0.25, %v1387_v61  ;;  %v2320_v63 = vpop.f32.mrb[11].mxu0  ;;  %v1393_v0 = vadd.f32 %v1391_v57, %v810_v27 }
 0x3a4   : > { %v1395_v1 = vsel %vm970_vm3, %v1393_v0, -inf  ;;  %v1394_v4 = vadd.f32 %v1392_v62, %v811_v34 }
 0x3a5   : > { %1396 = vmax.xlane.f32.xlu0 %v1395_v1 }
 0x3a6   : > { %v1398_v5 = vsel %vm970_vm3, %v1394_v4, -inf }
 0x3a7   : > { %1399 = vmax.xlane.f32.xlu1 %v1398_v5 }
 0x422   : > { %v1024_v6 = vpop.xlane.xlu0 %1023 }
 0x423   : > { %v1028_v7 = vsub.f32 %v1020_v33, %v1024_v6 }
 0x424   : > { %v1027_v8 = vpop.xlane.xlu1 %1026 }
 0x425   : > { %v1030_v9 = vmul.f32 1.442695, %v1028_v7  ;;  %v1029_v10 = vsub.f32 %v1021_v37, %v1027_v8 }
 0x426   : > { %v1146_v11 = vpop.xlane.xlu0 %1145 }
 0x427   : > { %2423 = vpow2.f32 %v1030_v9  ;;  %v1032_v12 = vmul.f32 1.442695, %v1029_v10  ;;  %v1150_v13 = vsub.f32 %v1142_v38, %v1146_v11 }
 0x429   : > { %2425 = vpow2.f32 %v1032_v12  ;;  %v1152_v14 = vmul.f32 1.442695, %v1150_v13 }
 0x42a   : > { %v1149_v15 = vpop.xlane.xlu0 %1148 }
 0x42b   : > { %2427 = vpow2.f32 %v1152_v14  ;;  %v1151_v16 = vsub.f32 %v1143_v48, %v1149_v15 }
 0x42c   : > { %v1275_v17 = vpop.xlane.xlu1 %1274 }
 0x42d   : > { %v1154_v18 = vmul.f32 1.442695, %v1151_v16  ;;  %v1277_v19 = vsub.f32 %v1269_v53, %v1275_v17 }
 0x42e   : > { %v1272_v20 = vpop.xlane.xlu0 %1271 }
 0x42f   : > { %2429 = vpow2.f32 %v1154_v18  ;;  %v1280_v21 = vmul.f32 1.442695, %v1277_v19  ;;  %v1276_v22 = vsub.f32 %v1268_v54, %v1272_v20 }
 0x431   : > { %v2424_v23 = vpop.eup %2423  ;;  %2431 = vpow2.f32 %v1280_v21  ;;  %v1278_v25 = vmul.f32 1.442695, %v1276_v22 }
 0x432   : > { %v1397_v26 = vpop.xlane.xlu0 %1396  ;;  %v1034_v27 = vsel %vm970_vm3, %v2424_v23, 0.0 }
 0x433   : > { %v2426_v28 = vpop.eup %2425  ;;  %2433 = vpow2.f32 %v1278_v25  ;;  %v1401_v29 = vsub.f32 %v1393_v0, %v1397_v26  ;;  %1035 = vadd.xlane.f32.xlu0 %v1034_v27 }
 0x434   : > { %v1037_v30 = vsel %vm970_vm3, %v2426_v28, 0.0  ;;  %v1400_v42 = vpop.xlane.xlu1 %1399 }
 0x435   : > { %v2428_v31 = vpop.eup %2427  ;;  %v1403_v32 = vmul.f32 1.442695, %v1401_v29  ;;  %1038 = vadd.xlane.f32.xlu1 %v1037_v30  ;;  %v1402_v46 = vsub.f32 %v1394_v4, %v1400_v42 }
 0x436   : > { %v1156_v33 = vsel %vm970_vm3, %v2428_v31, 0.0 }
 0x437   : > { %2435 = vpow2.f32 %v1403_v32  ;;  %1157 = vadd.xlane.f32.xlu0 %v1156_v33  ;;  %v1405_v48 = vmul.f32 1.442695, %v1402_v46 }
 0x439   : > { %v2430_v34 = vpop.eup %2429  ;;  %2437 = vpow2.f32 %v1405_v48 }
 0x43a   : > { %v1159_v35 = vsel %vm970_vm3, %v2430_v34, 0.0 }
 0x43b   : > { %v2432_v36 = vpop.eup %2431  ;;  %1160 = vadd.xlane.f32.xlu1 %v1159_v35 }
 0x43c   : > { %v1285_v38 = vsel %vm970_vm3, %v2432_v36, 0.0 }
 0x43d   : > { %v2434_v37 = vpop.eup %2433 }
 0x43e   : > { %v1282_v39 = vsel %vm970_vm3, %v2434_v37, 0.0 }
 0x43f   : > { %1286 = vadd.xlane.f32.xlu1 %v1285_v38  ;;  %1283 = vadd.xlane.f32.xlu0 %v1282_v39 }
 0x441   : > { %v2436_v40 = vpop.eup %2435 }
 0x442   : > { %v1407_v41 = vsel %vm970_vm3, %v2436_v40, 0.0 }
 0x443   : > { %1408 = vadd.xlane.f32.xlu0 %v1407_v41  ;;  %v2438_v49 = vpop.eup %2437 }
 0x444   : > { %v1410_v50 = vsel %vm970_vm3, %v2438_v49, 0.0 }
 0x450   : > { %1293 = vrot.lane.b32.xlu1 %v2718_v59, %s2485_s25  ;;  %s2958_s25 = sld [smem:[#allocation14_spill]] (!%p2223_p5) }
 0x459   : > { %1168 = vrot.lane.b32.xlu0 %v2718_v59, %s2484_s10  ;;  %s2951_s10 = smov 48  }
 0x474   : > { %1411 = vadd.xlane.f32.xlu1 %v1410_v50 }
 0x485   : > { %1418 = vrot.lane.b32.xlu1 %v2718_v59, %s2487_s21 }
 0x4c0   : > { %v1036_v51 = vpop.xlane.xlu0 %1035 }
 0x4c1   : > { %2439 = vrcp.f32 %v1036_v51 }
 0x4c2   : > { %v1039_v52 = vpop.xlane.xlu1 %1038 }
 0x4c3   : > { %2441 = vrcp.f32 %v1039_v52 }
 0x4c4   : > { %v1158_v53 = vpop.xlane.xlu0 %1157 }
 0x4c5   : > { %2443 = vrcp.f32 %v1158_v53 }
 0x4c8   : > { %v1161_v54 = vpop.xlane.xlu1 %1160 }
 0x4c9   : > { %2445 = vrcp.f32 %v1161_v54 }
 0x4cb   : > { %v2440_v55 = vpop.eup %2439 }
 0x4cc   : > { %v1287_v56 = vpop.xlane.xlu1 %1286  ;;  %v1284_v57 = vpop.xlane.xlu0 %1283  ;;  %v1042_v60 = vmul.f32 %v2440_v55, %v2424_v23 }
 0x4cd   : > { %v2442_v58 = vpop.eup %2441  ;;  %2447 = vrcp.f32 %v1287_v56 }
 0x4ce   : > { %v1043_v61 = vmul.f32 %v2442_v58, %v2426_v28  ;;  %2449 = vrcp.f32 %v1284_v57  ;;  %v2387_v28 = vld [vmem:[%s2632_s23] sm:$0xff]  }
 0x4cf   : > { %v2444_v0 = vpop.eup %2443  ;;  %2328 = vmatpush3.bf16.msra.mxu0 %v2387_v28 }
 0x4d0   : > { %v1409_v62 = vpop.xlane.xlu0 %1408  ;;  %v1044_v63 = vpack.c.bf16 %v1043_v61, %v1042_v60  ;;  %v1164_v5 = vmul.f32 %v2444_v0, %v2428_v31  ;;  %v1294_v9 = vpop.permute.xlu1 %1293  ;;  %v2388_v31 = vld [vmem:[%s2632_s23 + $0x8] sm:$0xff]   ;;  %2329 = vmatprep.subr.bf16.mxu0 %v2480_v44 }
 0x4d1   : > { %2451 = vrcp.f32 %v1409_v62 }
 0x4d2   : > { %2288 = vmatmul.mubr.msk.bf16.vlgmr.msra.gmra.mrb[8].mxu1 %vm970_vm3, %v1044_v63 }
 0x4d3   : > { %v2446_v59 = vpop.eup %2445  ;;  %2299 = vmatprep.mubr.msk.bf16.mxu1 %vm2481_vm2, %v2480_v44  ;;  %2330 = vmatpush3.bf16.msra.mxu0 %v2388_v31 }
 0x4d4   : > { %v1165_v1 = vmul.f32 %v2446_v59, %v2430_v34  ;;  %v1169_v4 = vpop.permute.xlu0 %1168  ;;  %2331 = vmatprep.subr.bf16.mxu0 %v2480_v44 }
 0x4d5   : > { %2298 = vmatpush3.bf16.msra.mxu1 %v1169_v4 }
 0x4d6   : > { %2309 = vmatprep.subr.bf16.mxu1 %v2480_v44  ;;  %v1166_v7 = vpack.c.bf16 %v1165_v1, %v1164_v5 }
 0x4d7   : > { %v2448_v6 = vpop.eup %2447 }
 0x4d8   : > { %v2450_v8 = vpop.eup %2449  ;;  %v1291_v10 = vmul.f32 %v2448_v6, %v2432_v36 }
 0x4d9   : > { %v1290_v11 = vmul.f32 %v2450_v8, %v2434_v37  ;;  %v2390_v37 = vld [vmem:[%s2632_s23 + $0x18] sm:$0xff]  }
 0x4da   : > { %2300 = vmatmul.mubr.msk.bf16.vlgmr.msra.gmra.mrb[12].mxu1 %vm970_vm3, %v1166_v7 }
 0x4db   : > { %2310 = vmatpush3.bf16.msra.mxu1 %v1294_v9  ;;  %2311 = vmatprep.mubr.msk.bf16.mxu1 %vm2481_vm2, %v2480_v44  ;;  %v1292_v12 = vpack.c.bf16 %v1291_v10, %v1290_v11  ;;  %v2452_v15 = vpop.eup %2451 }
 0x4dc   : > { %2321 = vmatprep.subr.bf16.mxu1 %v2480_v44  ;;  %v1415_v17 = vmul.f32 %v2452_v15, %v2436_v40 }
 0x4e2   : > { %2312 = vmatmul.mubr.msk.bf16.vlgmr.msra.gmra.mrb[16].mxu1 %vm970_vm3, %v1292_v12 }
 0x4e3   : > { %2323 = vmatprep.mubr.msk.bf16.mxu1 %vm2481_vm2, %v2480_v44 }
 0x501   : > { %v1412_v13 = vpop.xlane.xlu1 %1411 }
 0x502   : > { %2453 = vrcp.f32 %v1412_v13 }
 0x505   : > { %v1419_v14 = vpop.permute.xlu1 %1418 }
 0x506   : > { %2322 = vmatpush3.bf16.msra.mxu1 %v1419_v14 }
 0x50c   : > { %v2454_v16 = vpop.eup %2453 }
 0x50d   : > { %v1416_v18 = vmul.f32 %v2454_v16, %v2438_v49 }
 0x50f   : > { %v1417_v19 = vpack.c.bf16 %v1416_v18, %v1415_v17 }
 0x511   : > { %2324 = vmatmul.mubr.msk.bf16.vlgmr.msra.gmra.mrb[20].mxu1 %vm970_vm3, %v1417_v19  ;;  %v2393_v19 = vld [vmem:[%s2645_s8 + $0x4] ss:$8 sps:$4 sm:$0xff]  }
 0x512   : > { %1723 = vmatprep.mubr.bf16.mxu1 %v2479_v24  ;;  %v2389_v24 = vld [vmem:[%s2632_s23 + $0x10] sm:$0xff]   ;;  %1691 = vmatprep.subr.bf16.mxu1 %v2393_v19 }
 0x513   : > { %2332 = vmatpush3.bf16.msra.mxu0 %v2389_v24 }
 0x514   : > { %2333 = vmatprep.subr.bf16.mxu0 %v2480_v44 }
 0x517   : > { %2334 = vmatpush3.bf16.msra.mxu0 %v2390_v37 }
 0x5a5   : > { %v1082_v20 = vpop.f32.mrb[8].mxu1 }
 0x5a6   : > { %v2289_v21 = vpop.f32.mrb[9].mxu1 }
 0x5a7   : > { %v1085_v22 = vpop.f32.mrb[10].mxu1  ;;  %v2396_v21 = vld [vmem:[%s2645_s8 + $0x14] ss:$8 sps:$4 sm:$0xff]  }
 0x5a8   : > { %v2290_v23 = vpop.f32.mrb[11].mxu1 }
 0x5a9   : > { %v2399_v23 = vld [vmem:[%s2645_s8 + $0x24] ss:$8 sps:$4 sm:$0xff]  }
 0x5ad   : > { %v1208_v25 = vpop.f32.mrb[12].mxu1 }
 0x5ae   : > { %v2301_v26 = vpop.f32.mrb[13].mxu1 }
 0x5af   : > { %v1211_v27 = vpop.f32.mrb[14].mxu1  ;;  %v2400_v26 = vld [vmem:[%s2645_s8 + $0x30] ss:$8 sps:$4 sm:$0xff]  }
 0x5b0   : > { %v2360_v29 = vpack.i.bf16 %v1211_v27, %v1208_v25  ;;  %v2302_v30 = vpop.f32.mrb[15].mxu1  ;;  %v2397_v25 = vld [vmem:[%s2645_s8 + $0x20] ss:$8 sps:$4 sm:$0xff]   ;;  %v2402_v27 = vld [vmem:[%s2645_s8 + $0x34] ss:$8 sps:$4 sm:$0xff]  }
 0x5b2   : > { %2361 = vrot.lane.b32.xlu1 %v2360_v29, %s2488_s28 }
 0x5b5   : > { %v1333_v32 = vpop.f32.mrb[16].mxu1 }
 0x5b6   : > { %v2313_v33 = vpop.f32.mrb[17].mxu1 }
 0x5b7   : > { %v1336_v34 = vpop.f32.mrb[18].mxu1 }
 0x5b8   : > { %v2365_v35 = vpack.i.bf16 %v1336_v34, %v1333_v32  ;;  %v2314_v36 = vpop.f32.mrb[19].mxu1 }
 0x5ba   : > { %2366 = vrot.lane.b32.xlu0 %v2365_v35, %s2486_s3  ;;  %s2952_s3 = scalar_lea.vmem %s2914_s12, %s2602_s20 }
 0x5bb   : > { %v2189_v63 = vld [vmem:[%s2952_s3] ss:$0 sm:$0xff] }
 0x5e4   : > { %v1458_v38 = vpop.f32.mrb[20].mxu1 }
 0x5e5   : > { %v2325_v39 = vpop.f32.mrb[21].mxu1 }
 0x5e6   : > { %v1461_v40 = vpop.f32.mrb[22].mxu1  ;;  %v2196_v39 = vld [vmem:[%s2954_s29] ss:$0 sm:$0xff] }
 0x5e7   : > { %v2370_v41 = vpack.i.bf16 %v1461_v40, %v1458_v38  ;;  %v2326_v42 = vpop.f32.mrb[23].mxu1 }
 0x5e9   : > { %2371 = vrot.lane.b32.xlu1 %v2370_v41, %s2951_s10 }
 0x624   : > { %v2362_v46 = vpop.permute.xlu1 %2361 }
 0x625   : > { %v2364_v49 = vunpack.i.h.bf16 %v2362_v46  ;;  %v2363_v50 = vunpack.i.l.bf16 %v2362_v46 }
 0x627   : > { %v1490_v44 = vsel %vm970_vm3, %v1085_v22, %v2364_v49  ;;  %v1489_v54 = vsel %vm970_vm3, %v1082_v20, %v2363_v50  ;;  %v2391_v20 = vld [vmem:[%s2645_s8] ss:$8 sps:$4 sm:$0xff]   ;;  %v2394_v22 = vld [vmem:[%s2645_s8 + $0x10] ss:$8 sps:$4 sm:$0xff]   ;;  %s2953_s8 = scalar_lea.vmem %s2915_s13, %s2602_s20 }
 0x628   : > { %1692 = vmatpush1.bf16.msra.mxu1 %v2391_v20  ;;  %v2195_v35 = vld [vmem:[%s2953_s8] ss:$0 sm:$0xff]  ;;  %v2405_v50 = vld [vmem:[%s2656_s4 + $0x48] sm:$0xff]  }
 0x629   : > { %1693 = vmatprep.subr.bf16.mxu1 %v2396_v21  ;;  %v2404_v49 = vld [vmem:[%s2656_s4] sm:$0xff]  }
 0x62c   : > { %v2367_v48 = vpop.permute.xlu0 %2366  ;;  %1694 = vmatpush1.bf16.msra.mxu1 %v2394_v22 }
 0x62d   : > { %v2369_v51 = vunpack.i.h.bf16 %v2367_v48  ;;  %v2368_v52 = vunpack.i.l.bf16 %v2367_v48  ;;  %1695 = vmatprep.subr.bf16.mxu1 %v2399_v23  ;;  %v2403_v48 = vld [vmem:[%s2656_s4 + $0x40] sm:$0xff]  }
 0x62e   : > { %2257 = vmatprep.subr.bf16.mxu0 %v2403_v48 }
 0x62f   : > { %v1493_v57 = vsel %vm1491_vm10, %v1490_v44, %v2369_v51  ;;  %v1492_v58 = vsel %vm1491_vm10, %v1489_v54, %v2368_v52  ;;  %v2406_v51 = vld [vmem:[%s2656_s4 + $0x8] sm:$0xff]   ;;  %v2407_v52 = vld [vmem:[%s2656_s4 + $0x50] sm:$0xff]   ;;  %v2409_v44 = vld [vmem:[%s2656_s4 + $0x58] sm:$0xff]  }
 0x630   : > { %1696 = vmatpush1.bf16.msra.mxu1 %v2397_v25  ;;  %v2410_v54 = vld [vmem:[%s2656_s4 + $0x18] sm:$0xff]  }
 0x631   : > { %1697 = vmatprep.subr.bf16.mxu1 %v2402_v27 }
 0x634   : > { %1698 = vmatpush1.bf16.msra.mxu1 %v2400_v26 }
 0x65b   : > { %v2372_v53 = vpop.permute.xlu1 %2371 }
 0x65c   : > { %v2374_v55 = vunpack.i.h.bf16 %v2372_v53  ;;  %v2373_v56 = vunpack.i.l.bf16 %v2372_v53  ;;  %v2408_v53 = vld [vmem:[%s2656_s4 + $0x10] sm:$0xff]  }
 0x65e   : > { %v1496_v60 = vsel %vm1494_vm11, %v1493_v57, %v2374_v55  ;;  %v1495_v61 = vsel %vm1494_vm11, %v1492_v58, %v2373_v56  ;;  %v2411_v55 = vld [vmem:[%s2656_s4 + $0x60] sm:$0xff]   ;;  %v2413_v57 = vld [vmem:[%s2656_s4 + $0x68] sm:$0xff]  }
 0x65f   : > { %v1497_v62 = vpack.c.bf16 %v1496_v60, %v1495_v61  ;;  %v2412_v56 = vld [vmem:[%s2656_s4 + $0x20] sm:$0xff]   ;;  %v2414_v58 = vld [vmem:[%s2656_s4 + $0x28] sm:$0xff]   ;;  %v2415_v60 = vld [vmem:[%s2656_s4 + $0x70] sm:$0xff]  }
 0x660   : > { %v2416_v61 = vld [vmem:[%s2656_s4 + $0x30] sm:$0xff]  }
 0x661   : > { %2336 = vmatmul.mubr.msk.bf16.vlgmr.msra.gmra.mrb[12].mxu0 %vm814_vm1, %v1497_v62  ;;  %v2417_v62 = vld [vmem:[%s2656_s4 + $0x78] sm:$0xff]  }
 0x662   : > { %2258 = vmatpush3.bf16.msra.mxu0 %v2404_v49 }
 0x663   : > { %2259 = vmatprep.subr.bf16.mxu0 %v2405_v50 }
 0x666   : > { %2260 = vmatpush3.bf16.msra.mxu0 %v2406_v51 }
 0x667   : > { %2261 = vmatprep.subr.bf16.mxu0 %v2407_v52  ;;  %v2206_v52 = vld [vmem:[%s2955_s1] ss:$0 sm:$0xff] }
 0x66a   : > { %2262 = vmatpush3.bf16.msra.mxu0 %v2408_v53 }
 0x66b   : > { %2263 = vmatprep.subr.bf16.mxu0 %v2409_v44 }
 0x66e   : > { %2264 = vmatpush3.bf16.msra.mxu0 %v2410_v54 }
 0x66f   : > { %2265 = vmatprep.subr.bf16.mxu0 %v2411_v55 }
 0x672   : > { %2266 = vmatpush3.bf16.msra.mxu0 %v2412_v56 }
 0x673   : > { %2267 = vmatprep.subr.bf16.mxu0 %v2413_v57 }
 0x676   : > { %2268 = vmatpush3.bf16.msra.mxu0 %v2414_v58 }
 0x677   : > { %2269 = vmatprep.subr.bf16.mxu0 %v2415_v60 }
 0x67a   : > { %2270 = vmatpush3.bf16.msra.mxu0 %v2416_v61 }
 0x67b   : > { %2271 = vmatprep.subr.bf16.mxu0 %v2417_v62 }
 0x734   : > { %v1574_v0 = vpop.f32.mrb[12].mxu0 }
 0x735   : > { %v1575_v59 = vadd.f32 %v2189_v63, %v1574_v0  ;;  %v2337_v1 = vpop.f32.mrb[13].mxu0  ;;  %v1636_v0 = vld [vmem:[%s2650_s22] sm:$0x3] }
 0x736   : > { %v1577_v4 = vpop.f32.mrb[14].mxu0  ;;  %v1645_v1 = vrot.slane %v1636_v0, %v875_v47 }
 0x737   : > { %v2820_v5 = vadd.f32 %v1575_v59, %v2669_v2  ;;  %v1578_v6 = vadd.f32 %v2189_v63, %v1577_v4  ;;  %v2338_v7 = vpop.f32.mrb[15].mxu0  ;;  %v2418_v63 = vld [vmem:[%s2656_s4 + $0x38] sm:$0xff]   ;;  %v1641_v59 = vrot.slane %v1636_v0, %v871_v45 }
 0x738   : > { %2272 = vmatpush3.bf16.msra.mxu0 %v2418_v63 }
 0x739   : > { %v2823_v8 = vadd.f32 %v1578_v6, %v2671_v3  ;;  %v1585_v9 = vsel %vm814_vm1, %v2820_v5, 0.0 }
 0x73a   : > { %1586 = vadd.xlane.f32.xlu0 %v1585_v9 }
 0x73b   : > { %v1588_v10 = vsel %vm814_vm1, %v2823_v8, 0.0 }
 0x73c   : > { %1589 = vadd.xlane.f32.xlu1 %v1588_v10 }
 0x7c7   : > { %v1587_v11 = vpop.xlane.xlu0 %1586 }
 0x7c8   : > { %v1591_v12 = vmul.f32 0.015625, %v1587_v11 }
 0x7c9   : > { %v1590_v2 = vpop.xlane.xlu1 %1589 }
 0x7ca   : > { %v1593_v13 = vsub.f32 %v2820_v5, %v1591_v12  ;;  %v1592_v14 = vmul.f32 0.015625, %v1590_v2 }
 0x7cc   : > { %v1594_v3 = vsub.f32 %v2823_v8, %v1592_v14  ;;  %v1595_v15 = vmul.f32 %v1593_v13, %v1593_v13 }
 0x7ce   : > { %v1597_v16 = vsel %vm814_vm1, %v1595_v15, 0.0  ;;  %v1596_v17 = vmul.f32 %v1594_v3, %v1594_v3 }
 0x7cf   : > { %1598 = vadd.xlane.f32.xlu0 %v1597_v16 }
 0x7d0   : > { %v1600_v18 = vsel %vm814_vm1, %v1596_v17, 0.0 }
 0x7d3   : > { %1601 = vadd.xlane.f32.xlu0 %v1600_v18 }
 0x85c   : > { %v1599_v28 = vpop.xlane.xlu0 %1598 }
 0x85d   : > { %v1603_v29 = vmul.f32 0.015625, %v1599_v28 }
 0x85f   : > { %v1605_v30 = vadd.f32 1e-05, %v1603_v29 }
 0x860   : > { %v1602_v31 = vpop.xlane.xlu0 %1601 }
 0x861   : > { %2455 = vrsqrt.f32 %v1605_v30  ;;  %v1604_v32 = vmul.f32 0.015625, %v1602_v31 }
 0x863   : > { %v1606_v24 = vadd.f32 1e-05, %v1604_v32 }
 0x865   : > { %2457 = vrsqrt.f32 %v1606_v24 }
 0x86b   : > { %v2456_v33 = vpop.eup %2455 }
 0x86c   : > { %v1609_v34 = vmul.f32 %v2456_v33, %v1593_v13 }
 0x86e   : > { %v1617_v37 = vmul.f32 %v2195_v35, %v1609_v34 }
 0x86f   : > { %v2458_v36 = vpop.eup %2457 }
 0x870   : > { %v1610_v38 = vmul.f32 %v2458_v36, %v1594_v3  ;;  %v1625_v41 = vadd.f32 %v2196_v39, %v1617_v37 }
 0x872   : > { %v1618_v40 = vmul.f32 %v2195_v35, %v1610_v38 }
 0x874   : > { %v1626_v42 = vadd.f32 %v2196_v39, %v1618_v40 }
 0x876   : > { %v1627_v46 = vpack.c.bf16 %v1626_v42, %v1625_v41 }
 0x878   : > { %2205 = vmatmul.mubr.msk.bf16.vlgmr.msra.gmra.mrb[24].mxu1 %vm814_vm1, %v1627_v46 }
 0x94b   : > { %v1725_v4 = vpop.f32.mrb[24].mxu1 }
 0x94c   : > { %v1726_v6 = vadd.f32 %v1725_v4, %v1641_v59  ;;  %v1727_v7 = vpop.f32.mrb[25].mxu1 }
 0x94d   : > { %v1728_v9 = vadd.f32 %v1727_v7, %v1645_v1  ;;  %v1729_v10 = vpop.f32.mrb[26].mxu1 }
 0x94e   : > { %v1738_v11 = vmul.f32 0.044715, %v1726_v6  ;;  %v1730_v12 = vadd.f32 %v1729_v10, %v1641_v59  ;;  %v1731_v2 = vpop.f32.mrb[27].mxu1  ;;  %v1734_v35 = vmul.f32 0.5, %v1726_v6 }
 0x94f   : > { %v1739_v13 = vmul.f32 0.044715, %v1728_v9  ;;  %v1732_v14 = vadd.f32 %v1731_v2, %v1645_v1  ;;  %v1735_v38 = vmul.f32 0.5, %v1728_v9 }
 0x950   : > { %v1742_v3 = vmul.f32 %v1738_v11, %v1726_v6  ;;  %v1740_v15 = vmul.f32 0.044715, %v1730_v12  ;;  %v1736_v36 = vmul.f32 0.5, %v1730_v12 }
 0x951   : > { %v1743_v16 = vmul.f32 %v1739_v13, %v1728_v9  ;;  %v1741_v17 = vmul.f32 0.044715, %v1732_v14  ;;  %v1737_v39 = vmul.f32 0.5, %v1732_v14 }
 0x952   : > { %v1746_v18 = vmul.f32 %v1742_v3, %v1726_v6  ;;  %v1744_v19 = vmul.f32 %v1740_v15, %v1730_v12 }
 0x953   : > { %v1747_v45 = vmul.f32 %v1743_v16, %v1728_v9  ;;  %v1745_v20 = vmul.f32 %v1741_v17, %v1732_v14  ;;  %v2224_v16 = vld [vmem:[%s2956_s26] ss:$0 sm:$0xff] (!%p2223_p5) }
 0x954   : > { %v1750_v43 = vadd.f32 %v1746_v18, %v1726_v6  ;;  %v1748_v47 = vmul.f32 %v1744_v19, %v1730_v12  ;;  %v2225_v18 = vld [vmem:[%s2957_s0] ss:$0 sm:$0xff] (!%p2223_p5) }
 0x955   : > { %v1749_v21 = vmul.f32 %v1745_v20, %v1732_v14  ;;  %v1751_v22 = vadd.f32 %v1747_v45, %v1728_v9 }
 0x956   : > { %v1754_v23 = vmul.f32 0.7978845, %v1750_v43  ;;  %v1752_v25 = vadd.f32 %v1748_v47, %v1730_v12 }
 0x957   : > { %v1753_v26 = vadd.f32 %v1749_v21, %v1732_v14  ;;  %v1755_v27 = vmul.f32 0.7978845, %v1751_v22 }
 0x958   : > { %2459 = vtanh.f32 %v1754_v23  ;;  %v1756_v28 = vmul.f32 0.7978845, %v1752_v25 }
 0x959   : > { %v1757_v29 = vmul.f32 0.7978845, %v1753_v26  ;;  %2461 = vtanh.f32 %v1755_v27 }
 0x95a   : > { %2463 = vtanh.f32 %v1756_v28 }
 0x95b   : > { %2465 = vtanh.f32 %v1757_v29 }
 0x962   : > { %v2460_v30 = vpop.eup %2459 }
 0x963   : > { %v2462_v31 = vpop.eup %2461  ;;  %v1762_v32 = vadd.f32 1.0, %v2460_v30 }
 0x964   : > { %v2464_v24 = vpop.eup %2463  ;;  %v1763_v33 = vadd.f32 1.0, %v2462_v31 }
 0x965   : > { %v2466_v34 = vpop.eup %2465  ;;  %v1764_v37 = vadd.f32 1.0, %v2464_v24  ;;  %v1766_v41 = vmul.f32 %v1762_v32, %v1734_v35 }
 0x966   : > { %v1765_v40 = vadd.f32 1.0, %v2466_v34  ;;  %v1767_v46 = vmul.f32 %v1763_v33, %v1735_v38 }
 0x967   : > { %v1768_v42 = vmul.f32 %v1764_v37, %v1736_v36 }
 0x968   : > { %v1769_v48 = vmul.f32 %v1765_v40, %v1737_v39 }
 0x969   : > { %v1770_v49 = vpack.c.bf16 %v1768_v42, %v1766_v41 }
 0x96a   : > { %v1771_v50 = vpack.c.bf16 %v1769_v48, %v1767_v46 }
 0x96c   : > { %1939 = vmatprep.mubr.bf16.mxu0 %v1771_v50 }
 0x96d   : > { %1940 = vmatmul.mubr.bf16.vlgmr.msra.gmra.mrb[16].mxu0 %v1770_v49 }
 0xa40   : > { %v2273_v51 = vpop.f32.mrb[16].mxu0 }
 0xa41   : > { %v2274_v53 = vpop.f32.mrb[17].mxu0 }
 0xa42   : > { %v2275_v44 = vadd.f32 %v2274_v53, %v2273_v51  ;;  %v2276_v54 = vpop.f32.mrb[18].mxu0 }
 0xa43   : > { %v2277_v55 = vpop.f32.mrb[19].mxu0 }
 0xa44   : > { %v1942_v56 = vadd.f32 %v2275_v44, %v2206_v52  ;;  %v2278_v57 = vadd.f32 %v2277_v55, %v2276_v54  ;;  %1955 = sbr.rel (%p2223_p5) target bundleno = 2952 (0xb88), region = 104 }
 0xa46   : > { %v1948_v58 = vadd.f32 %v1942_v56, %v2820_v5  ;;  %v1945_v60 = vadd.f32 %v2278_v57, %v2206_v52 }
 0xa48   : > { %1950 = vst.msk [vmem:[#allocation2] sm:$0xff] %vm814_vm1, %v1948_v58  ;;  %v1949_v61 = vadd.f32 %v1945_v60, %v2823_v8  ;;  %v1958_v62 = vsel (!%p2223_p5), %vm814_vm1, %v1948_v58, 0.0 }
 0xa49   : > { %1959 = vadd.xlane.f32.xlu0 (!%p2223_p5), %v1958_v62 }
 0xa4a   : > { %1951 = vst.msk [vmem:[#allocation2 + $0x8] sm:$0xff] %vm814_vm1, %v1949_v61  ;;  %v1961_v63 = vsel (!%p2223_p5), %vm814_vm1, %v1949_v61, 0.0 }
 0xa4d   : > { %1962 = vadd.xlane.f32.xlu0 %v1961_v63 }
 0xad6   : > { %v1960_v0 = vpop.xlane.xlu0 %1959 }
 0xad7   : > { %v1964_v59 = vmul.f32 0.015625, %v1960_v0 }
 0xad9   : > { %v1966_v1 = vsub.f32 %v1948_v58, %v1964_v59 }
 0xada   : > { %v1963_v5 = vpop.xlane.xlu0 %1962 }
 0xadb   : > { %v1965_v4 = vmul.f32 0.015625, %v1963_v5  ;;  %v1968_v6 = vmul.f32 %v1966_v1, %v1966_v1 }
 0xadd   : > { %v1967_v7 = vsub.f32 %v1949_v61, %v1965_v4  ;;  %v1970_v8 = vsel %vm814_vm1, %v1968_v6, 0.0 }
 0xade   : > { %1971 = vadd.xlane.f32.xlu1 %v1970_v8 }
 0xadf   : > { %v1969_v9 = vmul.f32 %v1967_v7, %v1967_v7 }
 0xae1   : > { %v1973_v10 = vsel %vm814_vm1, %v1969_v9, 0.0 }
 0xae2   : > { %1974 = vadd.xlane.f32.xlu1 %v1973_v10 }
 0xb6b   : > { %v1972_v11 = vpop.xlane.xlu1 %1971 }
 0xb6c   : > { %v1976_v12 = vmul.f32 0.015625, %v1972_v11 }
 0xb6e   : > { %v1978_v2 = vadd.f32 1e-05, %v1976_v12 }
 0xb6f   : > { %v1975_v13 = vpop.xlane.xlu1 %1974 }
 0xb70   : > { %2467 = vrsqrt.f32 %v1978_v2  ;;  %v1977_v14 = vmul.f32 0.015625, %v1975_v13 }
 0xb72   : > { %v1979_v3 = vadd.f32 1e-05, %v1977_v14 }
 0xb74   : > { %2469 = vrsqrt.f32 %v1979_v3 }
 0xb7a   : > { %v2468_v15 = vpop.eup %2467 }
 0xb7b   : > { %v1982_v17 = vmul.f32 %v2468_v15, %v1966_v1 }
 0xb7d   : > { %v1990_v19 = vmul.f32 %v2224_v16, %v1982_v17 }
 0xb7e   : > { %v2470_v45 = vpop.eup %2469 }
 0xb7f   : > { %v1998_v20 = vadd.f32 %v2225_v18, %v1990_v19  ;;  %v1983_v43 = vmul.f32 %v2470_v45, %v1967_v7 }
 0xb81   : > { %v2234_v47 = vpack.c.bf16 %v1998_v20, %v1998_v20  ;;  %v1991_v21 = vmul.f32 %v2224_v16, %v1983_v43 }
 0xb83   : > { %2009 = vst.msk [vmem:[%s2958_s25] sm:$0xf] %vm2008_vm12, %v2234_v47  ;;  %v1999_v22 = vadd.f32 %v2225_v18, %v1991_v21 }
 0xb85   : > { %v2235_v23 = vpack.c.bf16 %v1999_v22, %v1999_v22 }
 0xb87   : > { %2010 = vst.msk [vmem:[%s2958_s25 + $0x4] sm:$0xf] %vm2008_vm12, %v2235_v23 }
 0xb88 PF: > { %s2959_s28 = sld [smem:[#allocation3_spill]] }
 0xb8e   : > { %s29_s0 = sadd.s32 1, %s2959_s28  }
 0xb8f   : > { %p26_p6 = scmp.ge.s32.totalorder %s29_s0, 4  }
 0xb91   :  { %28 = sbr.rel (!%p26_p6) target bundleno = 12 (0xc), region = 163 }

</bundles_post_ra>
